<compile_context>
chip_gen: v6e
topology: v6e:2x2x1
jax: 0.10.0
libtpu: 0.0.40
codegen_flags: <defaults>
</compile_context>

<pallas_src>
import jax
import jax.numpy as jnp
from jax import lax
from jax.experimental import pallas as pl
from jax.experimental.pallas import tpu as pltpu


def make_dqnlstm_kernel(T, Bp, D, H, A):
    G = 4 * H  # gate width, PyTorch order i|f|g|o; == 128 (one lane tile) for H=32

    def kernel(x_ref, wih0_ref, whh0_ref, b0_ref,
               wih1_ref, whh1_ref, b1_ref,
               wfc_ref, bfc_ref, h0_ref, c0_ref,
               q_ref, hout_ref, cout_ref,
               out0_scr, pre_scr):
        # Static lane mask selecting the `g` gate (lanes [2H, 3H)). Hoisted so
        # the recurrent loop only does full-lane EUP/VPU work + one select.
        lane = lax.broadcasted_iota(jnp.int32, (Bp, G), 1)
        g_mask = (lane >= 2 * H) & (lane < 3 * H)

        def input_proj(x2d_bf16, wih_ref, b_ref):
            # One big MXU call for all T timesteps; bias folded in here so
            # nothing is re-broadcast inside the serial loop.
            pre = jnp.dot(x2d_bf16, wih_ref[...],
                          preferred_element_type=jnp.float32)       # (T*Bp, 4H)
            pre_scr[...] = (pre + b_ref[...]).reshape(T, Bp, G)

        def run_layer(whh_ref, h, c, store):
            whh = whh_ref[...]                                       # (H, 4H) bf16
            # T is small and static: full unroll gives the scheduler visibility
            # across steps; only h @ W_hh is on the sequential critical path.
            for t in range(T):
                gates = pre_scr[t] + jnp.dot(h.astype(jnp.bfloat16), whh,
                                             preferred_element_type=jnp.float32)
                sig = jax.nn.sigmoid(gates)         # full 128-lane EUP op
                th = jnp.tanh(gates)                # full 128-lane EUP op
                acts = jnp.where(g_mask, th, sig)   # i|f|g|o activations
                i_g = acts[:, 0 * H:1 * H]
                f_g = acts[:, 1 * H:2 * H]
                g_g = acts[:, 2 * H:3 * H]
                o_g = acts[:, 3 * H:4 * H]
                c = f_g * c + i_g * g_g             # f32 carries
                h = o_g * jnp.tanh(c)
                store(t, h)
            return h, c

        def store_layer0(t, h):
            out0_scr[t] = h        # stash layer-0 hidden sequence for layer 1

        def store_none(t, h):
            pass

        # ---- layer 0: input is x (already flattened to (T*Bp, D), bf16) ----
        input_proj(x_ref[...], wih0_ref, b0_ref)
        h0_fin, c0_fin = run_layer(whh0_ref, h0_ref[0], c0_ref[0], store_layer0)

        # ---- layer 1: input is the layer-0 hidden sequence ----
        # (T, Bp, H) -> (T*Bp, H) is layout-free since Bp == f32 sublane tile (8).
        input_proj(out0_scr[...].reshape(T * Bp, H).astype(jnp.bfloat16),
                   wih1_ref, b1_ref)
        h1_fin, c1_fin = run_layer(whh1_ref, h0_ref[1], c0_ref[1], store_none)

        # ---- FC head on the last-timestep output of the top layer ----
        q_ref[...] = (jnp.dot(h1_fin.astype(jnp.bfloat16), wfc_ref[...],
                              preferred_element_type=jnp.float32)
                      + bfc_ref[...])

        hout_ref[0] = h0_fin
        hout_ref[1] = h1_fin
        cout_ref[0] = c0_fin
        cout_ref[1] = c1_fin

    return kernel


def dqnlstm_forward(x, params, hidden):
    """x: (B, T, D) batch_first (PyTorch convention). hidden = (h0, c0), each (2, B, H)."""
    B, T, D = x.shape
    h0, c0 = hidden
    H = h0.shape[-1]
    A = params["w_fc"].shape[0]

    Bp = ((B + 7) // 8) * 8          # pad batch to the 8-sublane width
    pad = Bp - B

    # time-major, batch-padded, pre-flattened to (T*Bp, D) so the layer-0 input
    # projection is one MXU call with no in-kernel reshape of a bf16 3-D array.
    x_tm = jnp.transpose(x, (1, 0, 2)).astype(jnp.float32)          # (T, B, D)
    x_tm = jnp.pad(x_tm, ((0, 0), (0, pad), (0, 0)))                # (T, Bp, D)
    x_flat = x_tm.reshape(T * Bp, D).astype(jnp.bfloat16)

    h0p = jnp.pad(h0.astype(jnp.float32), ((0, 0), (0, pad), (0, 0)))
    c0p = jnp.pad(c0.astype(jnp.float32), ((0, 0), (0, pad), (0, 0)))

    bf16 = jnp.bfloat16
    f32 = jnp.float32
    wih0 = params["w_ih0"].T.astype(bf16)                           # (D, 4H)
    whh0 = params["w_hh0"].T.astype(bf16)                           # (H, 4H)
    b0 = (params["b_ih0"] + params["b_hh0"]).reshape(1, 4 * H).astype(f32)
    wih1 = params["w_ih1"].T.astype(bf16)                           # (H, 4H)
    whh1 = params["w_hh1"].T.astype(bf16)                           # (H, 4H)
    b1 = (params["b_ih1"] + params["b_hh1"]).reshape(1, 4 * H).astype(f32)
    wfc = params["w_fc"].T.astype(bf16)                             # (H, A)
    bfc = params["b_fc"].reshape(1, A).astype(f32)

    kernel = make_dqnlstm_kernel(T, Bp, D, H, A)
    vspec = pl.BlockSpec(memory_space=pltpu.MemorySpace.VMEM)

    q, h_out, c_out = pl.pallas_call(
        kernel,
        out_shape=(
            jax.ShapeDtypeStruct((Bp, A), f32),
            jax.ShapeDtypeStruct((2, Bp, H), f32),
            jax.ShapeDtypeStruct((2, Bp, H), f32),
        ),
        in_specs=[vspec] * 11,
        out_specs=(vspec, vspec, vspec),
        scratch_shapes=[
            # Layer-0 hidden sequence and hoisted input projections.  These
            # scale with T; for long replay sequences store the hidden seq in
            # bf16 and/or chunk T (v7x has only 64 MiB VMEM).
            pltpu.VMEM((T, Bp, H), f32),
            pltpu.VMEM((T, Bp, 4 * H), f32),
        ],
        compiler_params=pltpu.CompilerParams(
            vmem_limit_bytes=32 * 1024 * 1024),
    )(x_flat, wih0, whh0, b0, wih1, whh1, b1, wfc, bfc, h0p, c0p)

    # Slice padded batch rows back off.
    return q[:B], (h_out[:, :B], c_out[:, :B])


# ---------------- pure-JAX reference (mirrors torch.nn.LSTM semantics) ----------------
def reference_forward(x, params, hidden):
    B, T, D = x.shape
    h0, c0 = hidden
    H = h0.shape[-1]

    def layer(seq, wih, whh, b, h, c):
        outs = []
        for t in range(T):
            gates = seq[:, t, :] @ wih.T + h @ whh.T + b
            i_g = jax.nn.sigmoid(gates[:, 0 * H:1 * H])
            f_g = jax.nn.sigmoid(gates[:, 1 * H:2 * H])
            g_g = jnp.tanh(gates[:, 2 * H:3 * H])
            o_g = jax.nn.sigmoid(gates[:, 3 * H:4 * H])
            c = f_g * c + i_g * g_g
            h = o_g * jnp.tanh(c)
            outs.append(h)
        return jnp.stack(outs, axis=1), h, c

    seq0, h0f, c0f = layer(x, params["w_ih0"], params["w_hh0"],
                           params["b_ih0"] + params["b_hh0"], h0[0], c0[0])
    seq1, h1f, c1f = layer(seq0, params["w_ih1"], params["w_hh1"],
                           params["b_ih1"] + params["b_hh1"], h0[1], c0[1])
    q = seq1[:, -1, :] @ params["w_fc"].T + params["b_fc"]
    return q, (jnp.stack([h0f, h1f]), jnp.stack([c0f, c1f]))


if __name__ == "__main__":
    B, T, D, H, A = 2, 8, 16, 32, 4  # batch, seq, input_dim, hidden_dim, action_dim

    key = jax.random.PRNGKey(0)
    ks = jax.random.split(key, 12)
    k_init = 1.0 / jnp.sqrt(jnp.float32(H))

    def u(k, shape):
        return jax.random.uniform(k, shape, jnp.float32, -k_init, k_init)

    params = {
        "w_ih0": u(ks[0], (4 * H, D)),
        "w_hh0": u(ks[1], (4 * H, H)),
        "b_ih0": u(ks[2], (4 * H,)),
        "b_hh0": u(ks[3], (4 * H,)),
        "w_ih1": u(ks[4], (4 * H, H)),
        "w_hh1": u(ks[5], (4 * H, H)),
        "b_ih1": u(ks[6], (4 * H,)),
        "b_hh1": u(ks[7], (4 * H,)),
        "w_fc":  u(ks[8], (A, H)),
        "b_fc":  u(ks[9], (A,)),
    }

    x = jax.random.normal(ks[10], (B, T, D), jnp.float32)
    h0 = jnp.zeros((2, B, H), jnp.float32)  # init_hidden()
    c0 = jnp.zeros((2, B, H), jnp.float32)

    fwd = jax.jit(dqnlstm_forward)
    q, (h_out, c_out) = fwd(x, params, (h0, c0))
    jax.block_until_ready((q, h_out, c_out))

    q_ref, (h_ref, c_ref) = reference_forward(x, params, (h0, c0))
    # MXU operands are bf16 (per perf review), so tolerance vs the f32
    # reference is loosened accordingly.
    assert jnp.allclose(q, q_ref, rtol=3e-2, atol=3e-2)
    assert jnp.allclose(h_out, h_ref, rtol=3e-2, atol=3e-2)
    assert jnp.allclose(c_out, c_ref, rtol=3e-2, atol=3e-2)

    print("KERNEL_OK")
</pallas_src>

<mosaic_0001>
module attributes {stable_mosaic.version = 11 : i64} {
  func.func @kernel(%arg0: memref<64x16xbf16, #tpu.memory_space<vmem>>, %arg1: memref<16x128xbf16, #tpu.memory_space<vmem>>, %arg2: memref<32x128xbf16, #tpu.memory_space<vmem>>, %arg3: memref<1x128xf32, #tpu.memory_space<vmem>>, %arg4: memref<32x128xbf16, #tpu.memory_space<vmem>>, %arg5: memref<32x128xbf16, #tpu.memory_space<vmem>>, %arg6: memref<1x128xf32, #tpu.memory_space<vmem>>, %arg7: memref<32x4xbf16, #tpu.memory_space<vmem>>, %arg8: memref<1x4xf32, #tpu.memory_space<vmem>>, %arg9: memref<2x8x32xf32, #tpu.memory_space<vmem>>, %arg10: memref<2x8x32xf32, #tpu.memory_space<vmem>>, %arg11: memref<8x4xf32, #tpu.memory_space<vmem>>, %arg12: memref<2x8x32xf32, #tpu.memory_space<vmem>>, %arg13: memref<2x8x32xf32, #tpu.memory_space<vmem>>, %arg14: memref<8x8x32xf32, #tpu.memory_space<vmem>>, %arg15: memref<8x8x128xf32, #tpu.memory_space<vmem>>) attributes {dimension_semantics = [], scalar_prefetch = 0 : i64, scratch_operands = 2 : i64, tpu.core_type = #tpu.core_type<tc>} {
    %0 = tpu.iota {dimensions = array<i32: 1>} : vector<8x128xi32>
    %c64_i32 = arith.constant 64 : i32
    %1 = vector.broadcast %c64_i32 : i32 to vector<8x128xi32>
    %2 = arith.cmpi sge, %0, %1 : vector<8x128xi32>
    %c96_i32 = arith.constant 96 : i32
    %3 = vector.broadcast %c96_i32 : i32 to vector<8x128xi32>
    %4 = arith.cmpi slt, %0, %3 : vector<8x128xi32>
    %5 = arith.andi %2, %4 : vector<8x128xi1>
    %c0 = arith.constant 0 : index
    %c0_0 = arith.constant 0 : index
    %6 = vector.load %arg0[%c0, %c0_0] : memref<64x16xbf16, #tpu.memory_space<vmem>>, vector<64x16xbf16>
    %c0_1 = arith.constant 0 : index
    %c0_2 = arith.constant 0 : index
    %7 = vector.load %arg1[%c0_1, %c0_2] : memref<16x128xbf16, #tpu.memory_space<vmem>>, vector<16x128xbf16>
    %cst = arith.constant dense<0.000000e+00> : vector<64x128xf32>
    %8 = tpu.matmul %6, %7, %cst {dimension_numbers = #tpu.dot_dimension_numbers<[1], [0], [0], [1], [0, 0, 1, 1], [], []>} : vector<64x16xbf16>, vector<16x128xbf16>, vector<64x128xf32> -> vector<64x128xf32>
    %c0_3 = arith.constant 0 : index
    %c0_4 = arith.constant 0 : index
    %9 = vector.load %arg3[%c0_3, %c0_4] : memref<1x128xf32, #tpu.memory_space<vmem>>, vector<1x128xf32>
    %10 = vector.broadcast %9 : vector<1x128xf32> to vector<64x128xf32>
    %11 = arith.addf %8, %10 : vector<64x128xf32>
    %12 = vector.shape_cast %11 : vector<64x128xf32> to vector<8x8x128xf32>
    %c0_5 = arith.constant 0 : index
    %c0_6 = arith.constant 0 : index
    %c0_7 = arith.constant 0 : index
    %13 = vector.load %arg15[%c0_5, %c0_6, %c0_7] : memref<8x8x128xf32, #tpu.memory_space<vmem>>, vector<8x8x128xf32>
    tpu.vector_store %arg15[%c0_5, %c0_6, %c0_7], %12 {strides = array<i32>} : memref<8x8x128xf32, #tpu.memory_space<vmem>>, vector<8x8x128xf32>,
    %c0_8 = arith.constant 0 : index
    %c0_9 = arith.constant 0 : index
    %c0_10 = arith.constant 0 : index
    %14 = vector.load %arg9[%c0_8, %c0_9, %c0_10] : memref<2x8x32xf32, #tpu.memory_space<vmem>>, vector<1x8x32xf32>
    %15 = vector.shape_cast %14 : vector<1x8x32xf32> to vector<8x32xf32>
    %c0_11 = arith.constant 0 : index
    %c0_12 = arith.constant 0 : index
    %c0_13 = arith.constant 0 : index
    %16 = vector.load %arg10[%c0_11, %c0_12, %c0_13] : memref<2x8x32xf32, #tpu.memory_space<vmem>>, vector<1x8x32xf32>
    %17 = vector.shape_cast %16 : vector<1x8x32xf32> to vector<8x32xf32>
    %c0_14 = arith.constant 0 : index
    %c0_15 = arith.constant 0 : index
    %18 = vector.load %arg2[%c0_14, %c0_15] : memref<32x128xbf16, #tpu.memory_space<vmem>>, vector<32x128xbf16>
    %c0_16 = arith.constant 0 : index
    %c0_17 = arith.constant 0 : index
    %c0_18 = arith.constant 0 : index
    %19 = vector.load %arg15[%c0_16, %c0_17, %c0_18] : memref<8x8x128xf32, #tpu.memory_space<vmem>>, vector<1x8x128xf32>
    %20 = vector.shape_cast %19 : vector<1x8x128xf32> to vector<8x128xf32>
    %21 = arith.truncf %15 : vector<8x32xf32> to vector<8x32xbf16>
    %cst_19 = arith.constant dense<0.000000e+00> : vector<8x128xf32>
    %22 = tpu.matmul %21, %18, %cst_19 {dimension_numbers = #tpu.dot_dimension_numbers<[1], [0], [0], [1], [0, 0, 1, 1], [], []>} : vector<8x32xbf16>, vector<32x128xbf16>, vector<8x128xf32> -> vector<8x128xf32>
    %23 = arith.addf %20, %22 : vector<8x128xf32>
    %24 = arith.negf %23 : vector<8x128xf32>
    %25 = math.exp %24 : vector<8x128xf32>
    %cst_20 = arith.constant 1.000000e+00 : f32
    %26 = vector.broadcast %cst_20 : f32 to vector<8x128xf32>
    %27 = arith.addf %26, %25 : vector<8x128xf32>
    %28 = arith.divf %26, %27 : vector<8x128xf32>
    %29 = math.tanh %23 : vector<8x128xf32>
    %30 = arith.select %5, %29, %28 : vector<8x128xi1>, vector<8x128xf32>
    %31 = vector.extract_strided_slice %30 {offsets = [0, 0], sizes = [8, 32], strides = [1, 1]} : vector<8x128xf32> to vector<8x32xf32>
    %32 = vector.extract_strided_slice %30 {offsets = [0, 32], sizes = [8, 32], strides = [1, 1]} : vector<8x128xf32> to vector<8x32xf32>
    %33 = vector.extract_strided_slice %30 {offsets = [0, 64], sizes = [8, 32], strides = [1, 1]} : vector<8x128xf32> to vector<8x32xf32>
    %34 = vector.extract_strided_slice %30 {offsets = [0, 96], sizes = [8, 32], strides = [1, 1]} : vector<8x128xf32> to vector<8x32xf32>
    %35 = arith.mulf %32, %17 : vector<8x32xf32>
    %36 = arith.mulf %31, %33 : vector<8x32xf32>
    %37 = arith.addf %35, %36 : vector<8x32xf32>
    %38 = math.tanh %37 : vector<8x32xf32>
    %39 = arith.mulf %34, %38 : vector<8x32xf32>
    %c0_21 = arith.constant 0 : index
    %c0_22 = arith.constant 0 : index
    %c0_23 = arith.constant 0 : index
    %40 = vector.load %arg14[%c0_21, %c0_22, %c0_23] : memref<8x8x32xf32, #tpu.memory_space<vmem>>, vector<1x8x32xf32>
    %41 = vector.shape_cast %40 : vector<1x8x32xf32> to vector<8x32xf32>
    %42 = vector.shape_cast %39 : vector<8x32xf32> to vector<1x8x32xf32>
    tpu.vector_store %arg14[%c0_21, %c0_22, %c0_23], %42 {strides = array<i32>} : memref<8x8x32xf32, #tpu.memory_space<vmem>>, vector<1x8x32xf32>,
    %c1 = arith.constant 1 : index
    %c0_24 = arith.constant 0 : index
    %c0_25 = arith.constant 0 : index
    %43 = vector.load %arg15[%c1, %c0_24, %c0_25] : memref<8x8x128xf32, #tpu.memory_space<vmem>>, vector<1x8x128xf32>
    %44 = vector.shape_cast %43 : vector<1x8x128xf32> to vector<8x128xf32>
    %45 = arith.truncf %39 : vector<8x32xf32> to vector<8x32xbf16>
    %cst_26 = arith.constant dense<0.000000e+00> : vector<8x128xf32>
    %46 = tpu.matmul %45, %18, %cst_26 {dimension_numbers = #tpu.dot_dimension_numbers<[1], [0], [0], [1], [0, 0, 1, 1], [], []>} : vector<8x32xbf16>, vector<32x128xbf16>, vector<8x128xf32> -> vector<8x128xf32>
    %47 = arith.addf %44, %46 : vector<8x128xf32>
    %48 = arith.negf %47 : vector<8x128xf32>
    %49 = math.exp %48 : vector<8x128xf32>
    %cst_27 = arith.constant 1.000000e+00 : f32
    %50 = vector.broadcast %cst_27 : f32 to vector<8x128xf32>
    %51 = arith.addf %50, %49 : vector<8x128xf32>
    %52 = arith.divf %50, %51 : vector<8x128xf32>
    %53 = math.tanh %47 : vector<8x128xf32>
    %54 = arith.select %5, %53, %52 : vector<8x128xi1>, vector<8x128xf32>
    %55 = vector.extract_strided_slice %54 {offsets = [0, 0], sizes = [8, 32], strides = [1, 1]} : vector<8x128xf32> to vector<8x32xf32>
    %56 = vector.extract_strided_slice %54 {offsets = [0, 32], sizes = [8, 32], strides = [1, 1]} : vector<8x128xf32> to vector<8x32xf32>
    %57 = vector.extract_strided_slice %54 {offsets = [0, 64], sizes = [8, 32], strides = [1, 1]} : vector<8x128xf32> to vector<8x32xf32>
    %58 = vector.extract_strided_slice %54 {offsets = [0, 96], sizes = [8, 32], strides = [1, 1]} : vector<8x128xf32> to vector<8x32xf32>
    %59 = arith.mulf %56, %37 : vector<8x32xf32>
    %60 = arith.mulf %55, %57 : vector<8x32xf32>
    %61 = arith.addf %59, %60 : vector<8x32xf32>
    %62 = math.tanh %61 : vector<8x32xf32>
    %63 = arith.mulf %58, %62 : vector<8x32xf32>
    %c1_28 = arith.constant 1 : index
    %c0_29 = arith.constant 0 : index
    %c0_30 = arith.constant 0 : index
    %64 = vector.load %arg14[%c1_28, %c0_29, %c0_30] : memref<8x8x32xf32, #tpu.memory_space<vmem>>, vector<1x8x32xf32>
    %65 = vector.shape_cast %64 : vector<1x8x32xf32> to vector<8x32xf32>
    %66 = vector.shape_cast %63 : vector<8x32xf32> to vector<1x8x32xf32>
    tpu.vector_store %arg14[%c1_28, %c0_29, %c0_30], %66 {strides = array<i32>} : memref<8x8x32xf32, #tpu.memory_space<vmem>>, vector<1x8x32xf32>,
    %c2 = arith.constant 2 : index
    %c0_31 = arith.constant 0 : index
    %c0_32 = arith.constant 0 : index
    %67 = vector.load %arg15[%c2, %c0_31, %c0_32] : memref<8x8x128xf32, #tpu.memory_space<vmem>>, vector<1x8x128xf32>
    %68 = vector.shape_cast %67 : vector<1x8x128xf32> to vector<8x128xf32>
    %69 = arith.truncf %63 : vector<8x32xf32> to vector<8x32xbf16>
    %cst_33 = arith.constant dense<0.000000e+00> : vector<8x128xf32>
    %70 = tpu.matmul %69, %18, %cst_33 {dimension_numbers = #tpu.dot_dimension_numbers<[1], [0], [0], [1], [0, 0, 1, 1], [], []>} : vector<8x32xbf16>, vector<32x128xbf16>, vector<8x128xf32> -> vector<8x128xf32>
    %71 = arith.addf %68, %70 : vector<8x128xf32>
    %72 = arith.negf %71 : vector<8x128xf32>
    %73 = math.exp %72 : vector<8x128xf32>
    %cst_34 = arith.constant 1.000000e+00 : f32
    %74 = vector.broadcast %cst_34 : f32 to vector<8x128xf32>
    %75 = arith.addf %74, %73 : vector<8x128xf32>
    %76 = arith.divf %74, %75 : vector<8x128xf32>
    %77 = math.tanh %71 : vector<8x128xf32>
    %78 = arith.select %5, %77, %76 : vector<8x128xi1>, vector<8x128xf32>
    %79 = vector.extract_strided_slice %78 {offsets = [0, 0], sizes = [8, 32], strides = [1, 1]} : vector<8x128xf32> to vector<8x32xf32>
    %80 = vector.extract_strided_slice %78 {offsets = [0, 32], sizes = [8, 32], strides = [1, 1]} : vector<8x128xf32> to vector<8x32xf32>
    %81 = vector.extract_strided_slice %78 {offsets = [0, 64], sizes = [8, 32], strides = [1, 1]} : vector<8x128xf32> to vector<8x32xf32>
    %82 = vector.extract_strided_slice %78 {offsets = [0, 96], sizes = [8, 32], strides = [1, 1]} : vector<8x128xf32> to vector<8x32xf32>
    %83 = arith.mulf %80, %61 : vector<8x32xf32>
    %84 = arith.mulf %79, %81 : vector<8x32xf32>
    %85 = arith.addf %83, %84 : vector<8x32xf32>
    %86 = math.tanh %85 : vector<8x32xf32>
    %87 = arith.mulf %82, %86 : vector<8x32xf32>
    %c2_35 = arith.constant 2 : index
    %c0_36 = arith.constant 0 : index
    %c0_37 = arith.constant 0 : index
    %88 = vector.load %arg14[%c2_35, %c0_36, %c0_37] : memref<8x8x32xf32, #tpu.memory_space<vmem>>, vector<1x8x32xf32>
    %89 = vector.shape_cast %88 : vector<1x8x32xf32> to vector<8x32xf32>
    %90 = vector.shape_cast %87 : vector<8x32xf32> to vector<1x8x32xf32>
    tpu.vector_store %arg14[%c2_35, %c0_36, %c0_37], %90 {strides = array<i32>} : memref<8x8x32xf32, #tpu.memory_space<vmem>>, vector<1x8x32xf32>,
    %c3 = arith.constant 3 : index
    %c0_38 = arith.constant 0 : index
    %c0_39 = arith.constant 0 : index
    %91 = vector.load %arg15[%c3, %c0_38, %c0_39] : memref<8x8x128xf32, #tpu.memory_space<vmem>>, vector<1x8x128xf32>
    %92 = vector.shape_cast %91 : vector<1x8x128xf32> to vector<8x128xf32>
    %93 = arith.truncf %87 : vector<8x32xf32> to vector<8x32xbf16>
    %cst_40 = arith.constant dense<0.000000e+00> : vector<8x128xf32>
    %94 = tpu.matmul %93, %18, %cst_40 {dimension_numbers = #tpu.dot_dimension_numbers<[1], [0], [0], [1], [0, 0, 1, 1], [], []>} : vector<8x32xbf16>, vector<32x128xbf16>, vector<8x128xf32> -> vector<8x128xf32>
    %95 = arith.addf %92, %94 : vector<8x128xf32>
    %96 = arith.negf %95 : vector<8x128xf32>
    %97 = math.exp %96 : vector<8x128xf32>
    %cst_41 = arith.constant 1.000000e+00 : f32
    %98 = vector.broadcast %cst_41 : f32 to vector<8x128xf32>
    %99 = arith.addf %98, %97 : vector<8x128xf32>
    %100 = arith.divf %98, %99 : vector<8x128xf32>
    %101 = math.tanh %95 : vector<8x128xf32>
    %102 = arith.select %5, %101, %100 : vector<8x128xi1>, vector<8x128xf32>
    %103 = vector.extract_strided_slice %102 {offsets = [0, 0], sizes = [8, 32], strides = [1, 1]} : vector<8x128xf32> to vector<8x32xf32>
    %104 = vector.extract_strided_slice %102 {offsets = [0, 32], sizes = [8, 32], strides = [1, 1]} : vector<8x128xf32> to vector<8x32xf32>
    %105 = vector.extract_strided_slice %102 {offsets = [0, 64], sizes = [8, 32], strides = [1, 1]} : vector<8x128xf32> to vector<8x32xf32>
    %106 = vector.extract_strided_slice %102 {offsets = [0, 96], sizes = [8, 32], strides = [1, 1]} : vector<8x128xf32> to vector<8x32xf32>
    %107 = arith.mulf %104, %85 : vector<8x32xf32>
    %108 = arith.mulf %103, %105 : vector<8x32xf32>
    %109 = arith.addf %107, %108 : vector<8x32xf32>
    %110 = math.tanh %109 : vector<8x32xf32>
    %111 = arith.mulf %106, %110 : vector<8x32xf32>
    %c3_42 = arith.constant 3 : index
    %c0_43 = arith.constant 0 : index
    %c0_44 = arith.constant 0 : index
    %112 = vector.load %arg14[%c3_42, %c0_43, %c0_44] : memref<8x8x32xf32, #tpu.memory_space<vmem>>, vector<1x8x32xf32>
    %113 = vector.shape_cast %112 : vector<1x8x32xf32> to vector<8x32xf32>
    %114 = vector.shape_cast %111 : vector<8x32xf32> to vector<1x8x32xf32>
    tpu.vector_store %arg14[%c3_42, %c0_43, %c0_44], %114 {strides = array<i32>} : memref<8x8x32xf32, #tpu.memory_space<vmem>>, vector<1x8x32xf32>,
    %c4 = arith.constant 4 : index
    %c0_45 = arith.constant 0 : index
    %c0_46 = arith.constant 0 : index
    %115 = vector.load %arg15[%c4, %c0_45, %c0_46] : memref<8x8x128xf32, #tpu.memory_space<vmem>>, vector<1x8x128xf32>
    %116 = vector.shape_cast %115 : vector<1x8x128xf32> to vector<8x128xf32>
    %117 = arith.truncf %111 : vector<8x32xf32> to vector<8x32xbf16>
    %cst_47 = arith.constant dense<0.000000e+00> : vector<8x128xf32>
    %118 = tpu.matmul %117, %18, %cst_47 {dimension_numbers = #tpu.dot_dimension_numbers<[1], [0], [0], [1], [0, 0, 1, 1], [], []>} : vector<8x32xbf16>, vector<32x128xbf16>, vector<8x128xf32> -> vector<8x128xf32>
    %119 = arith.addf %116, %118 : vector<8x128xf32>
    %120 = arith.negf %119 : vector<8x128xf32>
    %121 = math.exp %120 : vector<8x128xf32>
    %cst_48 = arith.constant 1.000000e+00 : f32
    %122 = vector.broadcast %cst_48 : f32 to vector<8x128xf32>
    %123 = arith.addf %122, %121 : vector<8x128xf32>
    %124 = arith.divf %122, %123 : vector<8x128xf32>
    %125 = math.tanh %119 : vector<8x128xf32>
    %126 = arith.select %5, %125, %124 : vector<8x128xi1>, vector<8x128xf32>
    %127 = vector.extract_strided_slice %126 {offsets = [0, 0], sizes = [8, 32], strides = [1, 1]} : vector<8x128xf32> to vector<8x32xf32>
    %128 = vector.extract_strided_slice %126 {offsets = [0, 32], sizes = [8, 32], strides = [1, 1]} : vector<8x128xf32> to vector<8x32xf32>
    %129 = vector.extract_strided_slice %126 {offsets = [0, 64], sizes = [8, 32], strides = [1, 1]} : vector<8x128xf32> to vector<8x32xf32>
    %130 = vector.extract_strided_slice %126 {offsets = [0, 96], sizes = [8, 32], strides = [1, 1]} : vector<8x128xf32> to vector<8x32xf32>
    %131 = arith.mulf %128, %109 : vector<8x32xf32>
    %132 = arith.mulf %127, %129 : vector<8x32xf32>
    %133 = arith.addf %131, %132 : vector<8x32xf32>
    %134 = math.tanh %133 : vector<8x32xf32>
    %135 = arith.mulf %130, %134 : vector<8x32xf32>
    %c4_49 = arith.constant 4 : index
    %c0_50 = arith.constant 0 : index
    %c0_51 = arith.constant 0 : index
    %136 = vector.load %arg14[%c4_49, %c0_50, %c0_51] : memref<8x8x32xf32, #tpu.memory_space<vmem>>, vector<1x8x32xf32>
    %137 = vector.shape_cast %136 : vector<1x8x32xf32> to vector<8x32xf32>
    %138 = vector.shape_cast %135 : vector<8x32xf32> to vector<1x8x32xf32>
    tpu.vector_store %arg14[%c4_49, %c0_50, %c0_51], %138 {strides = array<i32>} : memref<8x8x32xf32, #tpu.memory_space<vmem>>, vector<1x8x32xf32>,
    %c5 = arith.constant 5 : index
    %c0_52 = arith.constant 0 : index
    %c0_53 = arith.constant 0 : index
    %139 = vector.load %arg15[%c5, %c0_52, %c0_53] : memref<8x8x128xf32, #tpu.memory_space<vmem>>, vector<1x8x128xf32>
    %140 = vector.shape_cast %139 : vector<1x8x128xf32> to vector<8x128xf32>
    %141 = arith.truncf %135 : vector<8x32xf32> to vector<8x32xbf16>
    %cst_54 = arith.constant dense<0.000000e+00> : vector<8x128xf32>
    %142 = tpu.matmul %141, %18, %cst_54 {dimension_numbers = #tpu.dot_dimension_numbers<[1], [0], [0], [1], [0, 0, 1, 1], [], []>} : vector<8x32xbf16>, vector<32x128xbf16>, vector<8x128xf32> -> vector<8x128xf32>
    %143 = arith.addf %140, %142 : vector<8x128xf32>
    %144 = arith.negf %143 : vector<8x128xf32>
    %145 = math.exp %144 : vector<8x128xf32>
    %cst_55 = arith.constant 1.000000e+00 : f32
    %146 = vector.broadcast %cst_55 : f32 to vector<8x128xf32>
    %147 = arith.addf %146, %145 : vector<8x128xf32>
    %148 = arith.divf %146, %147 : vector<8x128xf32>
    %149 = math.tanh %143 : vector<8x128xf32>
    %150 = arith.select %5, %149, %148 : vector<8x128xi1>, vector<8x128xf32>
    %151 = vector.extract_strided_slice %150 {offsets = [0, 0], sizes = [8, 32], strides = [1, 1]} : vector<8x128xf32> to vector<8x32xf32>
    %152 = vector.extract_strided_slice %150 {offsets = [0, 32], sizes = [8, 32], strides = [1, 1]} : vector<8x128xf32> to vector<8x32xf32>
    %153 = vector.extract_strided_slice %150 {offsets = [0, 64], sizes = [8, 32], strides = [1, 1]} : vector<8x128xf32> to vector<8x32xf32>
    %154 = vector.extract_strided_slice %150 {offsets = [0, 96], sizes = [8, 32], strides = [1, 1]} : vector<8x128xf32> to vector<8x32xf32>
    %155 = arith.mulf %152, %133 : vector<8x32xf32>
    %156 = arith.mulf %151, %153 : vector<8x32xf32>
    %157 = arith.addf %155, %156 : vector<8x32xf32>
    %158 = math.tanh %157 : vector<8x32xf32>
    %159 = arith.mulf %154, %158 : vector<8x32xf32>
    %c5_56 = arith.constant 5 : index
    %c0_57 = arith.constant 0 : index
    %c0_58 = arith.constant 0 : index
    %160 = vector.load %arg14[%c5_56, %c0_57, %c0_58] : memref<8x8x32xf32, #tpu.memory_space<vmem>>, vector<1x8x32xf32>
    %161 = vector.shape_cast %160 : vector<1x8x32xf32> to vector<8x32xf32>
    %162 = vector.shape_cast %159 : vector<8x32xf32> to vector<1x8x32xf32>
    tpu.vector_store %arg14[%c5_56, %c0_57, %c0_58], %162 {strides = array<i32>} : memref<8x8x32xf32, #tpu.memory_space<vmem>>, vector<1x8x32xf32>,
    %c6 = arith.constant 6 : index
    %c0_59 = arith.constant 0 : index
    %c0_60 = arith.constant 0 : index
    %163 = vector.load %arg15[%c6, %c0_59, %c0_60] : memref<8x8x128xf32, #tpu.memory_space<vmem>>, vector<1x8x128xf32>
    %164 = vector.shape_cast %163 : vector<1x8x128xf32> to vector<8x128xf32>
    %165 = arith.truncf %159 : vector<8x32xf32> to vector<8x32xbf16>
    %cst_61 = arith.constant dense<0.000000e+00> : vector<8x128xf32>
    %166 = tpu.matmul %165, %18, %cst_61 {dimension_numbers = #tpu.dot_dimension_numbers<[1], [0], [0], [1], [0, 0, 1, 1], [], []>} : vector<8x32xbf16>, vector<32x128xbf16>, vector<8x128xf32> -> vector<8x128xf32>
    %167 = arith.addf %164, %166 : vector<8x128xf32>
    %168 = arith.negf %167 : vector<8x128xf32>
    %169 = math.exp %168 : vector<8x128xf32>
    %cst_62 = arith.constant 1.000000e+00 : f32
    %170 = vector.broadcast %cst_62 : f32 to vector<8x128xf32>
    %171 = arith.addf %170, %169 : vector<8x128xf32>
    %172 = arith.divf %170, %171 : vector<8x128xf32>
    %173 = math.tanh %167 : vector<8x128xf32>
    %174 = arith.select %5, %173, %172 : vector<8x128xi1>, vector<8x128xf32>
    %175 = vector.extract_strided_slice %174 {offsets = [0, 0], sizes = [8, 32], strides = [1, 1]} : vector<8x128xf32> to vector<8x32xf32>
    %176 = vector.extract_strided_slice %174 {offsets = [0, 32], sizes = [8, 32], strides = [1, 1]} : vector<8x128xf32> to vector<8x32xf32>
    %177 = vector.extract_strided_slice %174 {offsets = [0, 64], sizes = [8, 32], strides = [1, 1]} : vector<8x128xf32> to vector<8x32xf32>
    %178 = vector.extract_strided_slice %174 {offsets = [0, 96], sizes = [8, 32], strides = [1, 1]} : vector<8x128xf32> to vector<8x32xf32>
    %179 = arith.mulf %176, %157 : vector<8x32xf32>
    %180 = arith.mulf %175, %177 : vector<8x32xf32>
    %181 = arith.addf %179, %180 : vector<8x32xf32>
    %182 = math.tanh %181 : vector<8x32xf32>
    %183 = arith.mulf %178, %182 : vector<8x32xf32>
    %c6_63 = arith.constant 6 : index
    %c0_64 = arith.constant 0 : index
    %c0_65 = arith.constant 0 : index
    %184 = vector.load %arg14[%c6_63, %c0_64, %c0_65] : memref<8x8x32xf32, #tpu.memory_space<vmem>>, vector<1x8x32xf32>
    %185 = vector.shape_cast %184 : vector<1x8x32xf32> to vector<8x32xf32>
    %186 = vector.shape_cast %183 : vector<8x32xf32> to vector<1x8x32xf32>
    tpu.vector_store %arg14[%c6_63, %c0_64, %c0_65], %186 {strides = array<i32>} : memref<8x8x32xf32, #tpu.memory_space<vmem>>, vector<1x8x32xf32>,
    %c7 = arith.constant 7 : index
    %c0_66 = arith.constant 0 : index
    %c0_67 = arith.constant 0 : index
    %187 = vector.load %arg15[%c7, %c0_66, %c0_67] : memref<8x8x128xf32, #tpu.memory_space<vmem>>, vector<1x8x128xf32>
    %188 = vector.shape_cast %187 : vector<1x8x128xf32> to vector<8x128xf32>
    %189 = arith.truncf %183 : vector<8x32xf32> to vector<8x32xbf16>
    %cst_68 = arith.constant dense<0.000000e+00> : vector<8x128xf32>
    %190 = tpu.matmul %189, %18, %cst_68 {dimension_numbers = #tpu.dot_dimension_numbers<[1], [0], [0], [1], [0, 0, 1, 1], [], []>} : vector<8x32xbf16>, vector<32x128xbf16>, vector<8x128xf32> -> vector<8x128xf32>
    %191 = arith.addf %188, %190 : vector<8x128xf32>
    %192 = arith.negf %191 : vector<8x128xf32>
    %193 = math.exp %192 : vector<8x128xf32>
    %cst_69 = arith.constant 1.000000e+00 : f32
    %194 = vector.broadcast %cst_69 : f32 to vector<8x128xf32>
    %195 = arith.addf %194, %193 : vector<8x128xf32>
    %196 = arith.divf %194, %195 : vector<8x128xf32>
    %197 = math.tanh %191 : vector<8x128xf32>
    %198 = arith.select %5, %197, %196 : vector<8x128xi1>, vector<8x128xf32>
    %199 = vector.extract_strided_slice %198 {offsets = [0, 0], sizes = [8, 32], strides = [1, 1]} : vector<8x128xf32> to vector<8x32xf32>
    %200 = vector.extract_strided_slice %198 {offsets = [0, 32], sizes = [8, 32], strides = [1, 1]} : vector<8x128xf32> to vector<8x32xf32>
    %201 = vector.extract_strided_slice %198 {offsets = [0, 64], sizes = [8, 32], strides = [1, 1]} : vector<8x128xf32> to vector<8x32xf32>
    %202 = vector.extract_strided_slice %198 {offsets = [0, 96], sizes = [8, 32], strides = [1, 1]} : vector<8x128xf32> to vector<8x32xf32>
    %203 = arith.mulf %200, %181 : vector<8x32xf32>
    %204 = arith.mulf %199, %201 : vector<8x32xf32>
    %205 = arith.addf %203, %204 : vector<8x32xf32>
    %206 = math.tanh %205 : vector<8x32xf32>
    %207 = arith.mulf %202, %206 : vector<8x32xf32>
    %c7_70 = arith.constant 7 : index
    %c0_71 = arith.constant 0 : index
    %c0_72 = arith.constant 0 : index
    %208 = vector.load %arg14[%c7_70, %c0_71, %c0_72] : memref<8x8x32xf32, #tpu.memory_space<vmem>>, vector<1x8x32xf32>
    %209 = vector.shape_cast %208 : vector<1x8x32xf32> to vector<8x32xf32>
    %210 = vector.shape_cast %207 : vector<8x32xf32> to vector<1x8x32xf32>
    tpu.vector_store %arg14[%c7_70, %c0_71, %c0_72], %210 {strides = array<i32>} : memref<8x8x32xf32, #tpu.memory_space<vmem>>, vector<1x8x32xf32>,
    %c0_73 = arith.constant 0 : index
    %c0_74 = arith.constant 0 : index
    %c0_75 = arith.constant 0 : index
    %211 = vector.load %arg14[%c0_73, %c0_74, %c0_75] : memref<8x8x32xf32, #tpu.memory_space<vmem>>, vector<8x8x32xf32>
    %212 = vector.shape_cast %211 : vector<8x8x32xf32> to vector<64x32xf32>
    %213 = arith.truncf %212 : vector<64x32xf32> to vector<64x32xbf16>
    %c0_76 = arith.constant 0 : index
    %c0_77 = arith.constant 0 : index
    %214 = vector.load %arg4[%c0_76, %c0_77] : memref<32x128xbf16, #tpu.memory_space<vmem>>, vector<32x128xbf16>
    %cst_78 = arith.constant dense<0.000000e+00> : vector<64x128xf32>
    %215 = tpu.matmul %213, %214, %cst_78 {dimension_numbers = #tpu.dot_dimension_numbers<[1], [0], [0], [1], [0, 0, 1, 1], [], []>} : vector<64x32xbf16>, vector<32x128xbf16>, vector<64x128xf32> -> vector<64x128xf32>
    %c0_79 = arith.constant 0 : index
    %c0_80 = arith.constant 0 : index
    %216 = vector.load %arg6[%c0_79, %c0_80] : memref<1x128xf32, #tpu.memory_space<vmem>>, vector<1x128xf32>
    %217 = vector.broadcast %216 : vector<1x128xf32> to vector<64x128xf32>
    %218 = arith.addf %215, %217 : vector<64x128xf32>
    %219 = vector.shape_cast %218 : vector<64x128xf32> to vector<8x8x128xf32>
    %c0_81 = arith.constant 0 : index
    %c0_82 = arith.constant 0 : index
    %c0_83 = arith.constant 0 : index
    %220 = vector.load %arg15[%c0_81, %c0_82, %c0_83] : memref<8x8x128xf32, #tpu.memory_space<vmem>>, vector<8x8x128xf32>
    tpu.vector_store %arg15[%c0_81, %c0_82, %c0_83], %219 {strides = array<i32>} : memref<8x8x128xf32, #tpu.memory_space<vmem>>, vector<8x8x128xf32>,
    %c1_84 = arith.constant 1 : index
    %c0_85 = arith.constant 0 : index
    %c0_86 = arith.constant 0 : index
    %221 = vector.load %arg9[%c1_84, %c0_85, %c0_86] : memref<2x8x32xf32, #tpu.memory_space<vmem>>, vector<1x8x32xf32>
    %222 = vector.shape_cast %221 : vector<1x8x32xf32> to vector<8x32xf32>
    %c1_87 = arith.constant 1 : index
    %c0_88 = arith.constant 0 : index
    %c0_89 = arith.constant 0 : index
    %223 = vector.load %arg10[%c1_87, %c0_88, %c0_89] : memref<2x8x32xf32, #tpu.memory_space<vmem>>, vector<1x8x32xf32>
    %224 = vector.shape_cast %223 : vector<1x8x32xf32> to vector<8x32xf32>
    %c0_90 = arith.constant 0 : index
    %c0_91 = arith.constant 0 : index
    %225 = vector.load %arg5[%c0_90, %c0_91] : memref<32x128xbf16, #tpu.memory_space<vmem>>, vector<32x128xbf16>
    %c0_92 = arith.constant 0 : index
    %c0_93 = arith.constant 0 : index
    %c0_94 = arith.constant 0 : index
    %226 = vector.load %arg15[%c0_92, %c0_93, %c0_94] : memref<8x8x128xf32, #tpu.memory_space<vmem>>, vector<1x8x128xf32>
    %227 = vector.shape_cast %226 : vector<1x8x128xf32> to vector<8x128xf32>
    %228 = arith.truncf %222 : vector<8x32xf32> to vector<8x32xbf16>
    %cst_95 = arith.constant dense<0.000000e+00> : vector<8x128xf32>
    %229 = tpu.matmul %228, %225, %cst_95 {dimension_numbers = #tpu.dot_dimension_numbers<[1], [0], [0], [1], [0, 0, 1, 1], [], []>} : vector<8x32xbf16>, vector<32x128xbf16>, vector<8x128xf32> -> vector<8x128xf32>
    %230 = arith.addf %227, %229 : vector<8x128xf32>
    %231 = arith.negf %230 : vector<8x128xf32>
    %232 = math.exp %231 : vector<8x128xf32>
    %cst_96 = arith.constant 1.000000e+00 : f32
    %233 = vector.broadcast %cst_96 : f32 to vector<8x128xf32>
    %234 = arith.addf %233, %232 : vector<8x128xf32>
    %235 = arith.divf %233, %234 : vector<8x128xf32>
    %236 = math.tanh %230 : vector<8x128xf32>
    %237 = arith.select %5, %236, %235 : vector<8x128xi1>, vector<8x128xf32>
    %238 = vector.extract_strided_slice %237 {offsets = [0, 0], sizes = [8, 32], strides = [1, 1]} : vector<8x128xf32> to vector<8x32xf32>
    %239 = vector.extract_strided_slice %237 {offsets = [0, 32], sizes = [8, 32], strides = [1, 1]} : vector<8x128xf32> to vector<8x32xf32>
    %240 = vector.extract_strided_slice %237 {offsets = [0, 64], sizes = [8, 32], strides = [1, 1]} : vector<8x128xf32> to vector<8x32xf32>
    %241 = vector.extract_strided_slice %237 {offsets = [0, 96], sizes = [8, 32], strides = [1, 1]} : vector<8x128xf32> to vector<8x32xf32>
    %242 = arith.mulf %239, %224 : vector<8x32xf32>
    %243 = arith.mulf %238, %240 : vector<8x32xf32>
    %244 = arith.addf %242, %243 : vector<8x32xf32>
    %245 = math.tanh %244 : vector<8x32xf32>
    %246 = arith.mulf %241, %245 : vector<8x32xf32>
    %c1_97 = arith.constant 1 : index
    %c0_98 = arith.constant 0 : index
    %c0_99 = arith.constant 0 : index
    %247 = vector.load %arg15[%c1_97, %c0_98, %c0_99] : memref<8x8x128xf32, #tpu.memory_space<vmem>>, vector<1x8x128xf32>
    %248 = vector.shape_cast %247 : vector<1x8x128xf32> to vector<8x128xf32>
    %249 = arith.truncf %246 : vector<8x32xf32> to vector<8x32xbf16>
    %cst_100 = arith.constant dense<0.000000e+00> : vector<8x128xf32>
    %250 = tpu.matmul %249, %225, %cst_100 {dimension_numbers = #tpu.dot_dimension_numbers<[1], [0], [0], [1], [0, 0, 1, 1], [], []>} : vector<8x32xbf16>, vector<32x128xbf16>, vector<8x128xf32> -> vector<8x128xf32>
    %251 = arith.addf %248, %250 : vector<8x128xf32>
    %252 = arith.negf %251 : vector<8x128xf32>
    %253 = math.exp %252 : vector<8x128xf32>
    %cst_101 = arith.constant 1.000000e+00 : f32
    %254 = vector.broadcast %cst_101 : f32 to vector<8x128xf32>
    %255 = arith.addf %254, %253 : vector<8x128xf32>
    %256 = arith.divf %254, %255 : vector<8x128xf32>
    %257 = math.tanh %251 : vector<8x128xf32>
    %258 = arith.select %5, %257, %256 : vector<8x128xi1>, vector<8x128xf32>
    %259 = vector.extract_strided_slice %258 {offsets = [0, 0], sizes = [8, 32], strides = [1, 1]} : vector<8x128xf32> to vector<8x32xf32>
    %260 = vector.extract_strided_slice %258 {offsets = [0, 32], sizes = [8, 32], strides = [1, 1]} : vector<8x128xf32> to vector<8x32xf32>
    %261 = vector.extract_strided_slice %258 {offsets = [0, 64], sizes = [8, 32], strides = [1, 1]} : vector<8x128xf32> to vector<8x32xf32>
    %262 = vector.extract_strided_slice %258 {offsets = [0, 96], sizes = [8, 32], strides = [1, 1]} : vector<8x128xf32> to vector<8x32xf32>
    %263 = arith.mulf %260, %244 : vector<8x32xf32>
    %264 = arith.mulf %259, %261 : vector<8x32xf32>
    %265 = arith.addf %263, %264 : vector<8x32xf32>
    %266 = math.tanh %265 : vector<8x32xf32>
    %267 = arith.mulf %262, %266 : vector<8x32xf32>
    %c2_102 = arith.constant 2 : index
    %c0_103 = arith.constant 0 : index
    %c0_104 = arith.constant 0 : index
    %268 = vector.load %arg15[%c2_102, %c0_103, %c0_104] : memref<8x8x128xf32, #tpu.memory_space<vmem>>, vector<1x8x128xf32>
    %269 = vector.shape_cast %268 : vector<1x8x128xf32> to vector<8x128xf32>
    %270 = arith.truncf %267 : vector<8x32xf32> to vector<8x32xbf16>
    %cst_105 = arith.constant dense<0.000000e+00> : vector<8x128xf32>
    %271 = tpu.matmul %270, %225, %cst_105 {dimension_numbers = #tpu.dot_dimension_numbers<[1], [0], [0], [1], [0, 0, 1, 1], [], []>} : vector<8x32xbf16>, vector<32x128xbf16>, vector<8x128xf32> -> vector<8x128xf32>
    %272 = arith.addf %269, %271 : vector<8x128xf32>
    %273 = arith.negf %272 : vector<8x128xf32>
    %274 = math.exp %273 : vector<8x128xf32>
    %cst_106 = arith.constant 1.000000e+00 : f32
    %275 = vector.broadcast %cst_106 : f32 to vector<8x128xf32>
    %276 = arith.addf %275, %274 : vector<8x128xf32>
    %277 = arith.divf %275, %276 : vector<8x128xf32>
    %278 = math.tanh %272 : vector<8x128xf32>
    %279 = arith.select %5, %278, %277 : vector<8x128xi1>, vector<8x128xf32>
    %280 = vector.extract_strided_slice %279 {offsets = [0, 0], sizes = [8, 32], strides = [1, 1]} : vector<8x128xf32> to vector<8x32xf32>
    %281 = vector.extract_strided_slice %279 {offsets = [0, 32], sizes = [8, 32], strides = [1, 1]} : vector<8x128xf32> to vector<8x32xf32>
    %282 = vector.extract_strided_slice %279 {offsets = [0, 64], sizes = [8, 32], strides = [1, 1]} : vector<8x128xf32> to vector<8x32xf32>
    %283 = vector.extract_strided_slice %279 {offsets = [0, 96], sizes = [8, 32], strides = [1, 1]} : vector<8x128xf32> to vector<8x32xf32>
    %284 = arith.mulf %281, %265 : vector<8x32xf32>
    %285 = arith.mulf %280, %282 : vector<8x32xf32>
    %286 = arith.addf %284, %285 : vector<8x32xf32>
    %287 = math.tanh %286 : vector<8x32xf32>
    %288 = arith.mulf %283, %287 : vector<8x32xf32>
    %c3_107 = arith.constant 3 : index
    %c0_108 = arith.constant 0 : index
    %c0_109 = arith.constant 0 : index
    %289 = vector.load %arg15[%c3_107, %c0_108, %c0_109] : memref<8x8x128xf32, #tpu.memory_space<vmem>>, vector<1x8x128xf32>
    %290 = vector.shape_cast %289 : vector<1x8x128xf32> to vector<8x128xf32>
    %291 = arith.truncf %288 : vector<8x32xf32> to vector<8x32xbf16>
    %cst_110 = arith.constant dense<0.000000e+00> : vector<8x128xf32>
    %292 = tpu.matmul %291, %225, %cst_110 {dimension_numbers = #tpu.dot_dimension_numbers<[1], [0], [0], [1], [0, 0, 1, 1], [], []>} : vector<8x32xbf16>, vector<32x128xbf16>, vector<8x128xf32> -> vector<8x128xf32>
    %293 = arith.addf %290, %292 : vector<8x128xf32>
    %294 = arith.negf %293 : vector<8x128xf32>
    %295 = math.exp %294 : vector<8x128xf32>
    %cst_111 = arith.constant 1.000000e+00 : f32
    %296 = vector.broadcast %cst_111 : f32 to vector<8x128xf32>
    %297 = arith.addf %296, %295 : vector<8x128xf32>
    %298 = arith.divf %296, %297 : vector<8x128xf32>
    %299 = math.tanh %293 : vector<8x128xf32>
    %300 = arith.select %5, %299, %298 : vector<8x128xi1>, vector<8x128xf32>
    %301 = vector.extract_strided_slice %300 {offsets = [0, 0], sizes = [8, 32], strides = [1, 1]} : vector<8x128xf32> to vector<8x32xf32>
    %302 = vector.extract_strided_slice %300 {offsets = [0, 32], sizes = [8, 32], strides = [1, 1]} : vector<8x128xf32> to vector<8x32xf32>
    %303 = vector.extract_strided_slice %300 {offsets = [0, 64], sizes = [8, 32], strides = [1, 1]} : vector<8x128xf32> to vector<8x32xf32>
    %304 = vector.extract_strided_slice %300 {offsets = [0, 96], sizes = [8, 32], strides = [1, 1]} : vector<8x128xf32> to vector<8x32xf32>
    %305 = arith.mulf %302, %286 : vector<8x32xf32>
    %306 = arith.mulf %301, %303 : vector<8x32xf32>
    %307 = arith.addf %305, %306 : vector<8x32xf32>
    %308 = math.tanh %307 : vector<8x32xf32>
    %309 = arith.mulf %304, %308 : vector<8x32xf32>
    %c4_112 = arith.constant 4 : index
    %c0_113 = arith.constant 0 : index
    %c0_114 = arith.constant 0 : index
    %310 = vector.load %arg15[%c4_112, %c0_113, %c0_114] : memref<8x8x128xf32, #tpu.memory_space<vmem>>, vector<1x8x128xf32>
    %311 = vector.shape_cast %310 : vector<1x8x128xf32> to vector<8x128xf32>
    %312 = arith.truncf %309 : vector<8x32xf32> to vector<8x32xbf16>
    %cst_115 = arith.constant dense<0.000000e+00> : vector<8x128xf32>
    %313 = tpu.matmul %312, %225, %cst_115 {dimension_numbers = #tpu.dot_dimension_numbers<[1], [0], [0], [1], [0, 0, 1, 1], [], []>} : vector<8x32xbf16>, vector<32x128xbf16>, vector<8x128xf32> -> vector<8x128xf32>
    %314 = arith.addf %311, %313 : vector<8x128xf32>
    %315 = arith.negf %314 : vector<8x128xf32>
    %316 = math.exp %315 : vector<8x128xf32>
    %cst_116 = arith.constant 1.000000e+00 : f32
    %317 = vector.broadcast %cst_116 : f32 to vector<8x128xf32>
    %318 = arith.addf %317, %316 : vector<8x128xf32>
    %319 = arith.divf %317, %318 : vector<8x128xf32>
    %320 = math.tanh %314 : vector<8x128xf32>
    %321 = arith.select %5, %320, %319 : vector<8x128xi1>, vector<8x128xf32>
    %322 = vector.extract_strided_slice %321 {offsets = [0, 0], sizes = [8, 32], strides = [1, 1]} : vector<8x128xf32> to vector<8x32xf32>
    %323 = vector.extract_strided_slice %321 {offsets = [0, 32], sizes = [8, 32], strides = [1, 1]} : vector<8x128xf32> to vector<8x32xf32>
    %324 = vector.extract_strided_slice %321 {offsets = [0, 64], sizes = [8, 32], strides = [1, 1]} : vector<8x128xf32> to vector<8x32xf32>
    %325 = vector.extract_strided_slice %321 {offsets = [0, 96], sizes = [8, 32], strides = [1, 1]} : vector<8x128xf32> to vector<8x32xf32>
    %326 = arith.mulf %323, %307 : vector<8x32xf32>
    %327 = arith.mulf %322, %324 : vector<8x32xf32>
    %328 = arith.addf %326, %327 : vector<8x32xf32>
    %329 = math.tanh %328 : vector<8x32xf32>
    %330 = arith.mulf %325, %329 : vector<8x32xf32>
    %c5_117 = arith.constant 5 : index
    %c0_118 = arith.constant 0 : index
    %c0_119 = arith.constant 0 : index
    %331 = vector.load %arg15[%c5_117, %c0_118, %c0_119] : memref<8x8x128xf32, #tpu.memory_space<vmem>>, vector<1x8x128xf32>
    %332 = vector.shape_cast %331 : vector<1x8x128xf32> to vector<8x128xf32>
    %333 = arith.truncf %330 : vector<8x32xf32> to vector<8x32xbf16>
    %cst_120 = arith.constant dense<0.000000e+00> : vector<8x128xf32>
    %334 = tpu.matmul %333, %225, %cst_120 {dimension_numbers = #tpu.dot_dimension_numbers<[1], [0], [0], [1], [0, 0, 1, 1], [], []>} : vector<8x32xbf16>, vector<32x128xbf16>, vector<8x128xf32> -> vector<8x128xf32>
    %335 = arith.addf %332, %334 : vector<8x128xf32>
    %336 = arith.negf %335 : vector<8x128xf32>
    %337 = math.exp %336 : vector<8x128xf32>
    %cst_121 = arith.constant 1.000000e+00 : f32
    %338 = vector.broadcast %cst_121 : f32 to vector<8x128xf32>
    %339 = arith.addf %338, %337 : vector<8x128xf32>
    %340 = arith.divf %338, %339 : vector<8x128xf32>
    %341 = math.tanh %335 : vector<8x128xf32>
    %342 = arith.select %5, %341, %340 : vector<8x128xi1>, vector<8x128xf32>
    %343 = vector.extract_strided_slice %342 {offsets = [0, 0], sizes = [8, 32], strides = [1, 1]} : vector<8x128xf32> to vector<8x32xf32>
    %344 = vector.extract_strided_slice %342 {offsets = [0, 32], sizes = [8, 32], strides = [1, 1]} : vector<8x128xf32> to vector<8x32xf32>
    %345 = vector.extract_strided_slice %342 {offsets = [0, 64], sizes = [8, 32], strides = [1, 1]} : vector<8x128xf32> to vector<8x32xf32>
    %346 = vector.extract_strided_slice %342 {offsets = [0, 96], sizes = [8, 32], strides = [1, 1]} : vector<8x128xf32> to vector<8x32xf32>
    %347 = arith.mulf %344, %328 : vector<8x32xf32>
    %348 = arith.mulf %343, %345 : vector<8x32xf32>
    %349 = arith.addf %347, %348 : vector<8x32xf32>
    %350 = math.tanh %349 : vector<8x32xf32>
    %351 = arith.mulf %346, %350 : vector<8x32xf32>
    %c6_122 = arith.constant 6 : index
    %c0_123 = arith.constant 0 : index
    %c0_124 = arith.constant 0 : index
    %352 = vector.load %arg15[%c6_122, %c0_123, %c0_124] : memref<8x8x128xf32, #tpu.memory_space<vmem>>, vector<1x8x128xf32>
    %353 = vector.shape_cast %352 : vector<1x8x128xf32> to vector<8x128xf32>
    %354 = arith.truncf %351 : vector<8x32xf32> to vector<8x32xbf16>
    %cst_125 = arith.constant dense<0.000000e+00> : vector<8x128xf32>
    %355 = tpu.matmul %354, %225, %cst_125 {dimension_numbers = #tpu.dot_dimension_numbers<[1], [0], [0], [1], [0, 0, 1, 1], [], []>} : vector<8x32xbf16>, vector<32x128xbf16>, vector<8x128xf32> -> vector<8x128xf32>
    %356 = arith.addf %353, %355 : vector<8x128xf32>
    %357 = arith.negf %356 : vector<8x128xf32>
    %358 = math.exp %357 : vector<8x128xf32>
    %cst_126 = arith.constant 1.000000e+00 : f32
    %359 = vector.broadcast %cst_126 : f32 to vector<8x128xf32>
    %360 = arith.addf %359, %358 : vector<8x128xf32>
    %361 = arith.divf %359, %360 : vector<8x128xf32>
    %362 = math.tanh %356 : vector<8x128xf32>
    %363 = arith.select %5, %362, %361 : vector<8x128xi1>, vector<8x128xf32>
    %364 = vector.extract_strided_slice %363 {offsets = [0, 0], sizes = [8, 32], strides = [1, 1]} : vector<8x128xf32> to vector<8x32xf32>
    %365 = vector.extract_strided_slice %363 {offsets = [0, 32], sizes = [8, 32], strides = [1, 1]} : vector<8x128xf32> to vector<8x32xf32>
    %366 = vector.extract_strided_slice %363 {offsets = [0, 64], sizes = [8, 32], strides = [1, 1]} : vector<8x128xf32> to vector<8x32xf32>
    %367 = vector.extract_strided_slice %363 {offsets = [0, 96], sizes = [8, 32], strides = [1, 1]} : vector<8x128xf32> to vector<8x32xf32>
    %368 = arith.mulf %365, %349 : vector<8x32xf32>
    %369 = arith.mulf %364, %366 : vector<8x32xf32>
    %370 = arith.addf %368, %369 : vector<8x32xf32>
    %371 = math.tanh %370 : vector<8x32xf32>
    %372 = arith.mulf %367, %371 : vector<8x32xf32>
    %c7_127 = arith.constant 7 : index
    %c0_128 = arith.constant 0 : index
    %c0_129 = arith.constant 0 : index
    %373 = vector.load %arg15[%c7_127, %c0_128, %c0_129] : memref<8x8x128xf32, #tpu.memory_space<vmem>>, vector<1x8x128xf32>
    %374 = vector.shape_cast %373 : vector<1x8x128xf32> to vector<8x128xf32>
    %375 = arith.truncf %372 : vector<8x32xf32> to vector<8x32xbf16>
    %cst_130 = arith.constant dense<0.000000e+00> : vector<8x128xf32>
    %376 = tpu.matmul %375, %225, %cst_130 {dimension_numbers = #tpu.dot_dimension_numbers<[1], [0], [0], [1], [0, 0, 1, 1], [], []>} : vector<8x32xbf16>, vector<32x128xbf16>, vector<8x128xf32> -> vector<8x128xf32>
    %377 = arith.addf %374, %376 : vector<8x128xf32>
    %378 = arith.negf %377 : vector<8x128xf32>
    %379 = math.exp %378 : vector<8x128xf32>
    %cst_131 = arith.constant 1.000000e+00 : f32
    %380 = vector.broadcast %cst_131 : f32 to vector<8x128xf32>
    %381 = arith.addf %380, %379 : vector<8x128xf32>
    %382 = arith.divf %380, %381 : vector<8x128xf32>
    %383 = math.tanh %377 : vector<8x128xf32>
    %384 = arith.select %5, %383, %382 : vector<8x128xi1>, vector<8x128xf32>
    %385 = vector.extract_strided_slice %384 {offsets = [0, 0], sizes = [8, 32], strides = [1, 1]} : vector<8x128xf32> to vector<8x32xf32>
    %386 = vector.extract_strided_slice %384 {offsets = [0, 32], sizes = [8, 32], strides = [1, 1]} : vector<8x128xf32> to vector<8x32xf32>
    %387 = vector.extract_strided_slice %384 {offsets = [0, 64], sizes = [8, 32], strides = [1, 1]} : vector<8x128xf32> to vector<8x32xf32>
    %388 = vector.extract_strided_slice %384 {offsets = [0, 96], sizes = [8, 32], strides = [1, 1]} : vector<8x128xf32> to vector<8x32xf32>
    %389 = arith.mulf %386, %370 : vector<8x32xf32>
    %390 = arith.mulf %385, %387 : vector<8x32xf32>
    %391 = arith.addf %389, %390 : vector<8x32xf32>
    %392 = math.tanh %391 : vector<8x32xf32>
    %393 = arith.mulf %388, %392 : vector<8x32xf32>
    %394 = arith.truncf %393 : vector<8x32xf32> to vector<8x32xbf16>
    %c0_132 = arith.constant 0 : index
    %c0_133 = arith.constant 0 : index
    %395 = vector.load %arg7[%c0_132, %c0_133] : memref<32x4xbf16, #tpu.memory_space<vmem>>, vector<32x4xbf16>
    %cst_134 = arith.constant dense<0.000000e+00> : vector<8x4xf32>
    %396 = tpu.matmul %394, %395, %cst_134 {dimension_numbers = #tpu.dot_dimension_numbers<[1], [0], [0], [1], [0, 0, 1, 1], [], []>} : vector<8x32xbf16>, vector<32x4xbf16>, vector<8x4xf32> -> vector<8x4xf32>
    %c0_135 = arith.constant 0 : index
    %c0_136 = arith.constant 0 : index
    %397 = vector.load %arg8[%c0_135, %c0_136] : memref<1x4xf32, #tpu.memory_space<vmem>>, vector<1x4xf32>
    %398 = vector.broadcast %397 : vector<1x4xf32> to vector<8x4xf32>
    %399 = arith.addf %396, %398 : vector<8x4xf32>
    %c0_137 = arith.constant 0 : index
    %c0_138 = arith.constant 0 : index
    %400 = vector.load %arg11[%c0_137, %c0_138] : memref<8x4xf32, #tpu.memory_space<vmem>>, vector<8x4xf32>
    tpu.vector_store %arg11[%c0_137, %c0_138], %399 {strides = array<i32>} : memref<8x4xf32, #tpu.memory_space<vmem>>, vector<8x4xf32>,
    %c0_139 = arith.constant 0 : index
    %c0_140 = arith.constant 0 : index
    %c0_141 = arith.constant 0 : index
    %401 = vector.load %arg12[%c0_139, %c0_140, %c0_141] : memref<2x8x32xf32, #tpu.memory_space<vmem>>, vector<1x8x32xf32>
    %402 = vector.shape_cast %401 : vector<1x8x32xf32> to vector<8x32xf32>
    %403 = vector.shape_cast %207 : vector<8x32xf32> to vector<1x8x32xf32>
    tpu.vector_store %arg12[%c0_139, %c0_140, %c0_141], %403 {strides = array<i32>} : memref<2x8x32xf32, #tpu.memory_space<vmem>>, vector<1x8x32xf32>,
    %c1_142 = arith.constant 1 : index
    %c0_143 = arith.constant 0 : index
    %c0_144 = arith.constant 0 : index
    %404 = vector.load %arg12[%c1_142, %c0_143, %c0_144] : memref<2x8x32xf32, #tpu.memory_space<vmem>>, vector<1x8x32xf32>
    %405 = vector.shape_cast %404 : vector<1x8x32xf32> to vector<8x32xf32>
    %406 = vector.shape_cast %393 : vector<8x32xf32> to vector<1x8x32xf32>
    tpu.vector_store %arg12[%c1_142, %c0_143, %c0_144], %406 {strides = array<i32>} : memref<2x8x32xf32, #tpu.memory_space<vmem>>, vector<1x8x32xf32>,
    %c0_145 = arith.constant 0 : index
    %c0_146 = arith.constant 0 : index
    %c0_147 = arith.constant 0 : index
    %407 = vector.load %arg13[%c0_145, %c0_146, %c0_147] : memref<2x8x32xf32, #tpu.memory_space<vmem>>, vector<1x8x32xf32>
    %408 = vector.shape_cast %407 : vector<1x8x32xf32> to vector<8x32xf32>
    %409 = vector.shape_cast %205 : vector<8x32xf32> to vector<1x8x32xf32>
    tpu.vector_store %arg13[%c0_145, %c0_146, %c0_147], %409 {strides = array<i32>} : memref<2x8x32xf32, #tpu.memory_space<vmem>>, vector<1x8x32xf32>,
    %c1_148 = arith.constant 1 : index
    %c0_149 = arith.constant 0 : index
    %c0_150 = arith.constant 0 : index
    %410 = vector.load %arg13[%c1_148, %c0_149, %c0_150] : memref<2x8x32xf32, #tpu.memory_space<vmem>>, vector<1x8x32xf32>
    %411 = vector.shape_cast %410 : vector<1x8x32xf32> to vector<8x32xf32>
    %412 = vector.shape_cast %391 : vector<8x32xf32> to vector<1x8x32xf32>
    tpu.vector_store %arg13[%c1_148, %c0_149, %c0_150], %412 {strides = array<i32>} : memref<2x8x32xf32, #tpu.memory_space<vmem>>, vector<1x8x32xf32>,
    return
  }
}

</mosaic_0001>

<bundles_post_ra>
// kernel: dqnlstm_forward.1
= control target key start
LH: loop header
LB: loop body
LE: loop exit
PB: predicated region body
PF: predicated region fallthrough
CT: control target
= control target key end

     0   :  { %v2104_v0 = vmov 0.0   ;;  %vm2105_vm0 = vmmov 0   ;;  %vm90_vm1 = vcmask 130048   ;;  %vm196_vm2 = vcmask 261120   ;;  %s2107_s22 = smov 32   ;;  %s2108_s23 = smov 96   ;;  %s2608_s1 = inlined_call_operand.vmem [shape: bf16[16,128], index: 1, kind: input, shape index: {}]   ;;  %s2609_s2 = inlined_call_operand.vmem [shape: bf16[32,128], index: 2, kind: input, shape index: {}]   ;;  %s2610_s0 = inlined_call_operand.vmem [shape: bf16[64,16], index: 0, kind: input, shape index: {}]   ;;  %s2611_s9 = inlined_call_operand.vmem [shape: f32[2,8,32], index: 9, kind: input, shape index: {}]   ;;  %s2612_s3 = inlined_call_operand.vmem [shape: f32[1,128], index: 3, kind: input, shape index: {}]   ;;  %s2613_s10 = inlined_call_operand.vmem [shape: f32[2,8,32], index: 10, kind: input, shape index: {}]   ;;  %s2614_s4 = inlined_call_operand.vmem [shape: bf16[32,128], index: 4, kind: input, shape index: {}]   ;;  %s2615_s5 = inlined_call_operand.vmem [shape: bf16[32,128], index: 5, kind: input, shape index: {}]   ;;  %s2616_s6 = inlined_call_operand.vmem [shape: f32[1,128], index: 6, kind: input, shape index: {}]   ;;  %s2617_s12 = inlined_call_operand.vmem [shape: f32[2,8,32], index: 12, kind: output, shape index: {1}]   ;;  %s2618_s7 = inlined_call_operand.vmem [shape: bf16[32,4], index: 7, kind: input, shape index: {}]   ;;  %s2619_s13 = inlined_call_operand.vmem [shape: f32[2,8,32], index: 13, kind: output, shape index: {2}]   ;;  %s2620_s8 = inlined_call_operand.vmem [shape: f32[1,4], index: 8, kind: input, shape index: {}]   ;;  %s2621_s11 = inlined_call_operand.vmem [shape: f32[8,4], index: 11, kind: output, shape index: {0}]  }
   0x1   :  { %1810 = vmatprep.subr.bf16.mxu1 %v2104_v0  ;;  %v1963_v1 = vld [vmem:[%s2608_s1] sm:$0xff]   ;;  %1814 = vmatprep.mubr.msk.bf16.mxu1 %vm2105_vm0, %v2104_v0  ;;  %v2188_v2 = vld [vmem:[%s2609_s2 + $0x8] sm:$0xff]   ;;  %v42_v20 = vlaneseq  ;;  %v1968_v57 = vld [vmem:[%s2610_s0 + $0x10] sm:$0xff]   ;;  %vm1645_vm6 = vcmask 31744  }
   0x2   :  { %1800 = vmatprep.subr.bf16.mxu0 %v1963_v1  ;;  %v1965_v3 = vld [vmem:[%s2610_s0] sm:$0xff]   ;;  %1811 = vmatpush3.bf16.msra.mxu1 %v2188_v2  ;;  %v1966_v4 = vld [vmem:[%s2610_s0 + $0x8] sm:$0xff]   ;;  %v1969_v58 = vld [vmem:[%s2610_s0 + $0x18] sm:$0xff]  }
   0x3   :  { %1801 = vmatpush3.bf16.msra.mxu0 %v1963_v1  ;;  %1802 = vmatprep.mubr.msk.bf16.mxu0 %vm90_vm1, %v1965_v3  ;;  %v2202_v5 = vld [vmem:[%s2609_s2] sm:$0xff]   ;;  %v43_v21 = vand.u32 127, %v42_v20 }
   0x4   :  { %1812 = vmatprep.subr.bf16.mxu1 %v2104_v0  ;;  %v176_v6 = vld [vmem:[%s2611_s9] sm:$0xff]  ;;  %1826 = vmatprep.subr.bf16.mxu0 %v2104_v0 }
   0x5   :  { %v183_v7 = vpack.c.bf16 %v176_v6, %v176_v6  ;;  %v2227_v9 = vld [vmem:[%s2612_s3] ss:$0 sm:$0xff]  ;;  %vm44_vm3 = vcmp.ge.s32.totalorder %v43_v21, 64  ;;  %vm45_vm4 = vcmp.lt.s32.totalorder %v43_v21, 96  ;;  %s2106_s3 = smov 64  }
   0x6   :  { %1803 = vmatmul.mubr.msk.bf16.vlgmr.msra.gmra.mxu0 %vm90_vm1, %v1966_v4  ;;  %1813 = vmatpush3.bf16.msra.mxu1 %v2202_v5  ;;  %vm2230_vm5 = vmand %vm44_vm3, %vm45_vm4  ;;  %v177_v26 = vld [vmem:[%s2613_s10] sm:$0xff] }
   0x7   :  { %1827 = vmatpush3.bf16.msra.mxu0 %v2188_v2  ;;  %1818 = vmatprep.subr.bf16.mxu1 %v2104_v0  ;;  %v1975_v22 = vld [vmem:[%s2618_s7] sm:$0xff]  }
   0x8   :  { %1828 = vmatprep.subr.bf16.mxu0 %v2104_v0  ;;  %1806 = vmatprep.mubr.msk.bf16.mxu0 %vm90_vm1, %v1968_v57 }
   0x9   :  { %1815 = vmatmul.mubr.msk.bf16.vlgmr.msra.gmra.mxu1 %vm196_vm2, %v183_v7 }
   0xa   :  { %1819 = vmatpush3.bf16.msra.mxu1 %v2188_v2  ;;  %1822 = vmatprep.mubr.msk.bf16.mxu1 %vm2105_vm0, %v2104_v0 }
   0xb   :  { %1820 = vmatprep.subr.bf16.mxu1 %v2104_v0  ;;  %1829 = vmatpush3.bf16.msra.mxu0 %v2202_v5 }
   0xc   :  { %1842 = vmatprep.subr.bf16.mxu0 %v2104_v0 }
   0xe   :  { %1821 = vmatpush3.bf16.msra.mxu1 %v2202_v5  ;;  %1807 = vmatmul.mubr.msk.bf16.gmra.mxu0 %vm90_vm1, %v1969_v58 }
   0xf   :  { %1834 = vmatprep.subr.bf16.mxu1 %v2104_v0  ;;  %1830 = vmatprep.mubr.msk.bf16.mxu0 %vm2105_vm0, %v2104_v0 }
  0xc6   :  { %v2222_v8 = vpop.f32.mrf.mxu0 }
  0xc7   :  { %v146_v7 = vadd.f32 %v2222_v8, %v2227_v9 }
  0xc8   :  { %v137_v10 = vpop.f32.mrf.mxu0 }
  0xc9   :  { %v138_v11 = vadd.f32 %v2227_v9, %v137_v10  ;;  %v234_v12 = vpop.f32.mrf.mxu1 }
  0xca   :  { %v2255_v38 = vpop.f32.mrf.mxu0 }
  0xcb   :  { %v240_v13 = vadd.f32 %v234_v12, %v138_v11  ;;  %v1816_v14 = vpop.f32.mrf.mxu1 }
  0xcc   :  { %v140_v39 = vpop.f32.mrf.mxu0 }
  0xcd   :  { %v1690_v15 = vmul.f32 -1.442695, %v240_v13  ;;  %v237_v16 = vpop.f32.mrf.mxu1  ;;  %v141_v40 = vadd.f32 %v2227_v9, %v140_v39 }
  0xce   :  { %v2285_v1 = vpop.f32.mrf.mxu0 }
  0xcf   :  { %1976 = vpow2.f32 %v1690_v15  ;;  %v1817_v17 = vpop.f32.mrf.mxu1 }
  0xd0   :  { %1978 = vtanh.f32 %v240_v13  ;;  %v2287_v3 = vpop.f32.mrf.mxu0 }
  0xd2   :  { %v2289_v4 = vpop.f32.mrf.mxu0 }
  0xd4   :  { %v2291_v6 = vpop.f32.mrf.mxu0 }
  0xdc   :  { %v1977_v18 = vpop.eup %1976 }
  0xdd   :  { %v244_v19 = vadd.f32 1.0, %v1977_v18  ;;  %v1979_v23 = vpop.eup %1978 }
  0xdf   :  { %1980 = vrcp.f32 %v244_v19 }
  0xec   :  { %v1981_v24 = vpop.eup %1980 }
  0xed   :  { %v248_v25 = vsel %vm2230_vm5, %v1979_v23, %v1981_v24 }
  0xee   :  { %255 = vrot.lane.b32.xlu0 %v248_v25, %s2106_s3 }
  0xf2   :  { %250 = vrot.lane.b32.xlu0 %v177_v26, %s2107_s22 }
 0x160   :  { %v256_v27 = vpop.permute.xlu0 %255 }
 0x161   :  { %v258_v28 = vmul.f32 %v256_v27, %v248_v25 }
 0x163   :  { %260 = vrot.lane.b32.xlu1 %v258_v28, %s2107_s22 }
 0x164   :  { %v251_v29 = vpop.permute.xlu0 %250 }
 0x165   :  { %v253_v30 = vmul.f32 %v251_v29, %v248_v25 }
 0x1d5   :  { %v261_v31 = vpop.permute.xlu1 %260 }
 0x1d6   :  { %v263_v32 = vadd.f32 %v261_v31, %v253_v30  ;;  %v149_v31 = vadd.f32 %v2255_v38, %v2227_v9 }
 0x1d8   :  { %1982 = vtanh.f32 %v263_v32 }
 0x1e5   :  { %v1983_v33 = vpop.eup %1982 }
 0x1e6   :  { %266 = vrot.lane.b32.xlu1 %v1983_v33, %s2106_s3 }
 0x258   :  { %v267_v34 = vpop.permute.xlu1 %266 }
 0x259   :  { %v2243_v35 = vmul.f32 %v267_v34, %v248_v25 }
 0x25b   :  { %v277_v36 = vpack.c.bf16 %v2243_v35, %v2243_v35 }
 0x25d   :  { %279 = vrot.lane.b32.xlu0 %v277_v36, %s2107_s22 }
 0x2cf   :  { %v280_v37 = vpop.permute.xlu0 %279 }
 0x2d0   :  { %1823 = vmatmul.mubr.msk.bf16.vlgmr.msra.gmra.mxu1 %vm196_vm2, %v280_v37 }
 0x2d1   :  { %1835 = vmatpush3.bf16.msra.mxu1 %v2188_v2  ;;  %1838 = vmatprep.mubr.msk.bf16.mxu1 %vm2105_vm0, %v2104_v0 }
 0x2d2   :  { %1836 = vmatprep.subr.bf16.mxu1 %v2104_v0 }
 0x2d5   :  { %1837 = vmatpush3.bf16.msra.mxu1 %v2202_v5 }
 0x2d6   :  { %1850 = vmatprep.subr.bf16.mxu1 %v2104_v0 }
 0x390   :  { %v318_v41 = vpop.f32.mrf.mxu1 }
 0x391   :  { %v324_v42 = vadd.f32 %v318_v41, %v141_v40 }
 0x392   :  { %v1824_v43 = vpop.f32.mrf.mxu1 }
 0x393   :  { %v1692_v44 = vmul.f32 -1.442695, %v324_v42 }
 0x394   :  { %v321_v45 = vpop.f32.mrf.mxu1 }
 0x395   :  { %1984 = vpow2.f32 %v1692_v44 }
 0x396   :  { %v1825_v46 = vpop.f32.mrf.mxu1  ;;  %1986 = vtanh.f32 %v324_v42 }
 0x3a2   :  { %v1985_v47 = vpop.eup %1984 }
 0x3a3   :  { %v328_v48 = vadd.f32 1.0, %v1985_v47  ;;  %v1987_v49 = vpop.eup %1986 }
 0x3a5   :  { %1988 = vrcp.f32 %v328_v48 }
 0x3b2   :  { %v1989_v50 = vpop.eup %1988 }
 0x3b3   :  { %v332_v51 = vsel %vm2230_vm5, %v1987_v49, %v1989_v50 }
 0x3b4   :  { %335 = vrot.lane.b32.xlu1 %v332_v51, %s2106_s3  ;;  %v333_v54 = vmul.f32 %v332_v51, %v263_v32 }
 0x426   :  { %v336_v52 = vpop.permute.xlu1 %335 }
 0x427   :  { %v338_v53 = vmul.f32 %v336_v52, %v332_v51 }
 0x429   :  { %340 = vrot.lane.b32.xlu0 %v338_v53, %s2107_s22 }
 0x49b   :  { %v341_v55 = vpop.permute.xlu0 %340 }
 0x49c   :  { %v343_v56 = vadd.f32 %v341_v55, %v333_v54  ;;  %v154_v54 = vadd.f32 %v2227_v9, %v2287_v3 }
 0x49e   :  { %1990 = vtanh.f32 %v343_v56 }
 0x4ab   :  { %v1991_v59 = vpop.eup %1990 }
 0x4ac   :  { %346 = vrot.lane.b32.xlu1 %v1991_v59, %s2106_s3 }
 0x51e   :  { %v347_v60 = vpop.permute.xlu1 %346 }
 0x51f   :  { %v2273_v61 = vmul.f32 %v347_v60, %v332_v51 }
 0x521   :  { %v358_v62 = vpack.c.bf16 %v2273_v61, %v2273_v61 }
 0x523   :  { %360 = vrot.lane.b32.xlu0 %v358_v62, %s2107_s22 }
 0x595   :  { %v361_v63 = vpop.permute.xlu0 %360 }
 0x596   :  { %1831 = vmatmul.mubr.msk.bf16.vlgmr.msra.gmra.mxu0 %vm196_vm2, %v361_v63 }
 0x597   :  { %1843 = vmatpush3.bf16.msra.mxu0 %v2188_v2  ;;  %1846 = vmatprep.mubr.msk.bf16.mxu0 %vm2105_vm0, %v2104_v0 }
 0x598   :  { %1844 = vmatprep.subr.bf16.mxu0 %v2104_v0 }
 0x59b   :  { %1845 = vmatpush3.bf16.msra.mxu0 %v2202_v5 }
 0x59c   :  { %1858 = vmatprep.subr.bf16.mxu0 %v2104_v0 }
 0x656   :  { %v399_v10 = vpop.f32.mrf.mxu0 }
 0x657   :  { %v405_v11 = vadd.f32 %v399_v10, %v146_v7 }
 0x658   :  { %v1832_v12 = vpop.f32.mrf.mxu0 }
 0x659   :  { %v1694_v13 = vmul.f32 -1.442695, %v405_v11 }
 0x65a   :  { %v402_v14 = vpop.f32.mrf.mxu0 }
 0x65b   :  { %1992 = vpow2.f32 %v1694_v13 }
 0x65c   :  { %v1833_v15 = vpop.f32.mrf.mxu0  ;;  %1994 = vtanh.f32 %v405_v11 }
 0x668   :  { %v1993_v16 = vpop.eup %1992 }
 0x669   :  { %v409_v17 = vadd.f32 1.0, %v1993_v16  ;;  %v1995_v18 = vpop.eup %1994 }
 0x66b   :  { %1996 = vrcp.f32 %v409_v17 }
 0x678   :  { %v1997_v19 = vpop.eup %1996 }
 0x679   :  { %v413_v20 = vsel %vm2230_vm5, %v1995_v18, %v1997_v19 }
 0x67a   :  { %416 = vrot.lane.b32.xlu1 %v413_v20, %s2106_s3  ;;  %v414_v23 = vmul.f32 %v413_v20, %v343_v56 }
 0x6ec   :  { %v417_v21 = vpop.permute.xlu1 %416 }
 0x6ed   :  { %v419_v8 = vmul.f32 %v417_v21, %v413_v20  ;;  %v157_v21 = vadd.f32 %v2227_v9, %v2291_v6 }
 0x6ef   :  { %421 = vrot.lane.b32.xlu0 %v419_v8, %s2107_s22 }
 0x761   :  { %v422_v24 = vpop.permute.xlu0 %421 }
 0x762   :  { %v424_v25 = vadd.f32 %v422_v24, %v414_v23 }
 0x764   :  { %1998 = vtanh.f32 %v424_v25 }
 0x771   :  { %v1999_v26 = vpop.eup %1998 }
 0x772   :  { %427 = vrot.lane.b32.xlu1 %v1999_v26, %s2106_s3 }
 0x7e4   :  { %v428_v27 = vpop.permute.xlu1 %427 }
 0x7e5   :  { %v2300_v28 = vmul.f32 %v428_v27, %v413_v20 }
 0x7e7   :  { %v439_v29 = vpack.c.bf16 %v2300_v28, %v2300_v28 }
 0x7e9   :  { %441 = vrot.lane.b32.xlu0 %v439_v29, %s2107_s22 }
 0x85b   :  { %v442_v30 = vpop.permute.xlu0 %441 }
 0x85c   :  { %1839 = vmatmul.mubr.msk.bf16.vlgmr.msra.gmra.mxu1 %vm196_vm2, %v442_v30 }
 0x85d   :  { %1851 = vmatpush3.bf16.msra.mxu1 %v2188_v2  ;;  %1854 = vmatprep.mubr.msk.bf16.mxu1 %vm2105_vm0, %v2104_v0 }
 0x85e   :  { %1852 = vmatprep.subr.bf16.mxu1 %v2104_v0 }
 0x861   :  { %1853 = vmatpush3.bf16.msra.mxu1 %v2202_v5 }
 0x862   :  { %1866 = vmatprep.subr.bf16.mxu1 %v2104_v0 }
 0x91c   :  { %v480_v32 = vpop.f32.mrf.mxu1 }
 0x91d   :  { %v486_v33 = vadd.f32 %v480_v32, %v149_v31 }
 0x91e   :  { %v1840_v34 = vpop.f32.mrf.mxu1 }
 0x91f   :  { %v1696_v36 = vmul.f32 -1.442695, %v486_v33 }
 0x920   :  { %v483_v37 = vpop.f32.mrf.mxu1 }
 0x921   :  { %2000 = vpow2.f32 %v1696_v36 }
 0x922   :  { %v1841_v39 = vpop.f32.mrf.mxu1  ;;  %2002 = vtanh.f32 %v486_v33 }
 0x92e   :  { %v2001_v40 = vpop.eup %2000 }
 0x92f   :  { %v490_v41 = vadd.f32 1.0, %v2001_v40  ;;  %v2003_v42 = vpop.eup %2002 }
 0x931   :  { %2004 = vrcp.f32 %v490_v41 }
 0x93e   :  { %v2005_v43 = vpop.eup %2004 }
 0x93f   :  { %v494_v44 = vsel %vm2230_vm5, %v2003_v42, %v2005_v43  ;;  %v162_v43 = vadd.f32 %v2285_v1, %v2227_v9 }
 0x940   :  { %497 = vrot.lane.b32.xlu1 %v494_v44, %s2106_s3  ;;  %v495_v46 = vmul.f32 %v494_v44, %v424_v25 }
 0x9b2   :  { %v498_v45 = vpop.permute.xlu1 %497 }
 0x9b3   :  { %v500_v38 = vmul.f32 %v498_v45, %v494_v44 }
 0x9b5   :  { %502 = vrot.lane.b32.xlu0 %v500_v38, %s2107_s22 }
 0xa27   :  { %v503_v47 = vpop.permute.xlu0 %502 }
 0xa28   :  { %v505_v48 = vadd.f32 %v503_v47, %v495_v46 }
 0xa2a   :  { %2006 = vtanh.f32 %v505_v48 }
 0xa37   :  { %v2007_v49 = vpop.eup %2006 }
 0xa38   :  { %508 = vrot.lane.b32.xlu1 %v2007_v49, %s2106_s3 }
 0xaaa   :  { %v509_v50 = vpop.permute.xlu1 %508 }
 0xaab   :  { %v2319_v51 = vmul.f32 %v509_v50, %v494_v44 }
 0xaad   :  { %v520_v52 = vpack.c.bf16 %v2319_v51, %v2319_v51 }
 0xaaf   :  { %522 = vrot.lane.b32.xlu0 %v520_v52, %s2107_s22 }
 0xb21   :  { %v523_v53 = vpop.permute.xlu0 %522 }
 0xb22   :  { %1847 = vmatmul.mubr.msk.bf16.vlgmr.msra.gmra.mxu0 %vm196_vm2, %v523_v53 }
 0xb23   :  { %1859 = vmatpush3.bf16.msra.mxu0 %v2188_v2  ;;  %1862 = vmatprep.mubr.msk.bf16.mxu0 %vm2105_vm0, %v2104_v0 }
 0xb24   :  { %1860 = vmatprep.subr.bf16.mxu0 %v2104_v0 }
 0xb27   :  { %1861 = vmatpush3.bf16.msra.mxu0 %v2202_v5 }
 0xbe2   :  { %v561_v55 = vpop.f32.mrf.mxu0 }
 0xbe3   :  { %v567_v56 = vadd.f32 %v561_v55, %v154_v54 }
 0xbe4   :  { %v1848_v57 = vpop.f32.mrf.mxu0 }
 0xbe5   :  { %v1698_v58 = vmul.f32 -1.442695, %v567_v56 }
 0xbe6   :  { %v564_v59 = vpop.f32.mrf.mxu0 }
 0xbe7   :  { %2008 = vpow2.f32 %v1698_v58 }
 0xbe8   :  { %v1849_v60 = vpop.f32.mrf.mxu0  ;;  %2010 = vtanh.f32 %v567_v56 }
 0xbf4   :  { %v2009_v62 = vpop.eup %2008 }
 0xbf5   :  { %v571_v63 = vadd.f32 1.0, %v2009_v62  ;;  %v2011_v7 = vpop.eup %2010  ;;  %v1970_v62 = vld [vmem:[%s2614_s4 + $0x8] sm:$0xff]  }
 0xbf6   :  { %1874 = vmatprep.subr.bf16.mxu0 %v1970_v62 }
 0xbf7   :  { %2012 = vrcp.f32 %v571_v63 }
 0xc04   :  { %v2013_v10 = vpop.eup %2012 }
 0xc05   :  { %v575_v11 = vsel %vm2230_vm5, %v2011_v7, %v2013_v10 }
 0xc06   :  { %578 = vrot.lane.b32.xlu1 %v575_v11, %s2106_s3  ;;  %v576_v13 = vmul.f32 %v575_v11, %v505_v48 }
 0xc78   :  { %v579_v12 = vpop.permute.xlu1 %578 }
 0xc79   :  { %v581_v3 = vmul.f32 %v579_v12, %v575_v11 }
 0xc7b   :  { %583 = vrot.lane.b32.xlu0 %v581_v3, %s2107_s22 }
 0xced   :  { %v584_v14 = vpop.permute.xlu0 %583 }
 0xcee   :  { %v586_v15 = vadd.f32 %v584_v14, %v576_v13 }
 0xcf0   :  { %2014 = vtanh.f32 %v586_v15 }
 0xcfd   :  { %v2015_v16 = vpop.eup %2014 }
 0xcfe   :  { %589 = vrot.lane.b32.xlu1 %v2015_v16, %s2106_s3  ;;  %v2400_v16 = vld [vmem:[%s2615_s5 + $0x8] sm:$0xff]  }
 0xd70   :  { %v590_v17 = vpop.permute.xlu1 %589 }
 0xd71   :  { %v2337_v18 = vmul.f32 %v590_v17, %v575_v11  ;;  %v2408_v17 = vld [vmem:[%s2615_s5] sm:$0xff]  }
 0xd73   :  { %v601_v19 = vpack.c.bf16 %v2337_v18, %v2337_v18 }
 0xd75   :  { %603 = vrot.lane.b32.xlu0 %v601_v19, %s2107_s22  ;;  %v1713_v19 = vld [vmem:[%s2613_s10 + $0x8] sm:$0xff] }
 0xde7   :  { %v604_v20 = vpop.permute.xlu0 %603 }
 0xde8   :  { %1855 = vmatmul.mubr.msk.bf16.vlgmr.msra.gmra.mxu1 %vm196_vm2, %v604_v20 }
 0xde9   :  { %1867 = vmatpush3.bf16.msra.mxu1 %v2188_v2  ;;  %1870 = vmatprep.mubr.msk.bf16.mxu1 %vm2105_vm0, %v2104_v0 }
 0xdea   :  { %1868 = vmatprep.subr.bf16.mxu1 %v2104_v0 }
 0xded   :  { %1869 = vmatpush3.bf16.msra.mxu1 %v2202_v5 }
 0xdee   :  { %1886 = vmatprep.subr.bf16.mxu1 %v2104_v0 }
 0xea8   :  { %v642_v8 = vpop.f32.mrf.mxu1 }
 0xea9   :  { %v648_v23 = vadd.f32 %v642_v8, %v157_v21  ;;  %v1712_v21 = vld [vmem:[%s2611_s9 + $0x8] sm:$0xff] }
 0xeaa   :  { %v1856_v24 = vpop.f32.mrf.mxu1  ;;  %v971_v8 = vpack.c.bf16 %v1712_v21, %v1712_v21 }
 0xeab   :  { %v1700_v25 = vmul.f32 -1.442695, %v648_v23 }
 0xeac   :  { %v645_v26 = vpop.f32.mrf.mxu1 }
 0xead   :  { %2016 = vpow2.f32 %v1700_v25 }
 0xeae   :  { %v1857_v27 = vpop.f32.mrf.mxu1  ;;  %2018 = vtanh.f32 %v648_v23  ;;  %v165_v23 = vadd.f32 %v2289_v4, %v2227_v9 }
 0xeba   :  { %v2017_v2 = vpop.eup %2016 }
 0xebb   :  { %v652_v29 = vadd.f32 1.0, %v2017_v2  ;;  %v2019_v30 = vpop.eup %2018 }
 0xebd   :  { %2020 = vrcp.f32 %v652_v29 }
 0xeca   :  { %v2021_v31 = vpop.eup %2020 }
 0xecb   :  { %v656_v5 = vsel %vm2230_vm5, %v2019_v30, %v2021_v31  ;;  %v2440_v30 = vld [vmem:[%s2616_s6] ss:$0 sm:$0xff] }
 0xecc   :  { %659 = vrot.lane.b32.xlu1 %v656_v5, %s2106_s3  ;;  %v657_v33 = vmul.f32 %v656_v5, %v586_v15 }
 0xf3e   :  { %v660_v32 = vpop.permute.xlu1 %659 }
 0xf3f   :  { %v662_v6 = vmul.f32 %v660_v32, %v656_v5 }
 0xf41   :  { %664 = vrot.lane.b32.xlu0 %v662_v6, %s2107_s22 }
 0xfb3   :  { %v665_v34 = vpop.permute.xlu0 %664 }
 0xfb4   :  { %v667_v36 = vadd.f32 %v665_v34, %v657_v33 }
 0xfb6   :  { %2022 = vtanh.f32 %v667_v36 }
 0xfc3   :  { %v2023_v37 = vpop.eup %2022 }
 0xfc4   :  { %670 = vrot.lane.b32.xlu1 %v2023_v37, %s2106_s3 }
0x1036   :  { %v671_v39 = vpop.permute.xlu1 %670 }
0x1037   :  { %v2356_v40 = vmul.f32 %v671_v39, %v656_v5 }
0x1039   :  { %v682_v41 = vpack.c.bf16 %v2356_v40, %v2356_v40 }
0x103b   :  { %684 = vrot.lane.b32.xlu0 %v682_v41, %s2107_s22 }
0x10ad   :  { %v685_v42 = vpop.permute.xlu0 %684 }
0x10ae   :  { %1863 = vmatmul.mubr.msk.bf16.vlgmr.msra.gmra.mxu0 %vm196_vm2, %v685_v42 }
0x10af   :  { %1875 = vmatpush3.bf16.msra.mxu0 %v1970_v62 }
0x116e   :  { %v723_v44 = vpop.f32.mrf.mxu0 }
0x116f   :  { %v729_v45 = vadd.f32 %v723_v44, %v162_v43 }
0x1170   :  { %v1864_v38 = vpop.f32.mrf.mxu0 }
0x1171   :  { %v1702_v46 = vmul.f32 -1.442695, %v729_v45 }
0x1172   :  { %v726_v47 = vpop.f32.mrf.mxu0 }
0x1173   :  { %2024 = vpow2.f32 %v1702_v46 }
0x1174   :  { %v1865_v48 = vpop.f32.mrf.mxu0  ;;  %2026 = vtanh.f32 %v729_v45 }
0x1180   :  { %v2025_v49 = vpop.eup %2024 }
0x1181   :  { %v733_v50 = vadd.f32 1.0, %v2025_v49  ;;  %v2027_v52 = vpop.eup %2026 }
0x1183   :  { %2028 = vrcp.f32 %v733_v50 }
0x1190   :  { %v2029_v53 = vpop.eup %2028 }
0x1191   :  { %v737_v54 = vsel %vm2230_vm5, %v2027_v52, %v2029_v53 }
0x1192   :  { %740 = vrot.lane.b32.xlu1 %v737_v54, %s2106_s3  ;;  %v738_v56 = vmul.f32 %v737_v54, %v667_v36 }
0x1204   :  { %v741_v55 = vpop.permute.xlu1 %740 }
0x1205   :  { %v743_v1 = vmul.f32 %v741_v55, %v737_v54 }
0x1207   :  { %745 = vrot.lane.b32.xlu0 %v743_v1, %s2107_s22 }
0x120b   :  { %271 = vrot.lane.b32.xlu0 %v2243_v35, %s2107_s22  ;;  %v1971_v35 = vld [vmem:[%s2614_s4] sm:$0xff]  }
0x120c   :  { %1876 = vmatprep.subr.bf16.mxu0 %v1971_v35 }
0x120d   :  { %1877 = vmatpush3.bf16.msra.mxu0 %v1971_v35 }
0x120e   :  { %1902 = vmatprep.subr.bf16.mxu0 %v2104_v0 }
0x120f   :  { %432 = vrot.lane.b32.xlu0 %v2300_v28, %s2107_s22 }
0x1279   :  { %v746_v57 = vpop.permute.xlu0 %745 }
0x127a   :  { %v2372_v58 = vadd.f32 %v746_v57, %v738_v56 }
0x127c   :  { %2030 = vtanh.f32 %v2372_v58 }
0x127d   :  { %v272_v59 = vpop.permute.xlu0 %271 }
0x127e   :  { %274 = vst.msk [vmem:[#allocation2] sm:$0xff] %vm196_vm2, %v272_v59 }
0x1281   :  { %v433_v60 = vpop.permute.xlu0 %432 }
0x1282   :  { %436 = vst.msk [vmem:[#allocation2 + $0x10] sm:$0xff] %vm196_vm2, %v433_v60 }
0x1289   :  { %v2031_v28 = vpop.eup %2030 }
0x128a   :  { %751 = vrot.lane.b32.xlu1 %v2031_v28, %s2106_s3 }
0x128e   :  { %351 = vrot.lane.b32.xlu1 %v2273_v61, %s2107_s22  ;;  %v842_v61 = vld [vmem:[#allocation2] sm:$0xff] }
0x1292   :  { %513 = vrot.lane.b32.xlu1 %v2319_v51, %s2107_s22  ;;  %v844_v51 = vld [vmem:[#allocation2 + $0x10] sm:$0xff] }
0x12fc   :  { %v752_v63 = vpop.permute.xlu1 %751 }
0x12fd   :  { %v2389_v7 = vmul.f32 %v752_v63, %v737_v54 }
0x12ff   :  { %v763_v10 = vpack.c.bf16 %v2389_v7, %v2389_v7 }
0x1300   :  { %v352_v11 = vpop.permute.xlu1 %351 }
0x1301   :  { %355 = vst.msk [vmem:[#allocation2 + $0x8] sm:$0xff] %vm196_vm2, %v352_v11  ;;  %765 = vrot.lane.b32.xlu0 %v763_v10, %s2107_s22 }
0x1304   :  { %v514_v12 = vpop.permute.xlu1 %513 }
0x1305   :  { %517 = vst.msk [vmem:[#allocation2 + $0x18] sm:$0xff] %vm196_vm2, %v514_v12  ;;  %1037 = vrot.lane.b32.xlu0 %v1713_v19, %s2107_s22 }
0x1308   :  { %v843_v3 = vld [vmem:[#allocation2 + $0x8] sm:$0xff] }
0x1309   :  { %v850_v13 = vpack.c.bf16 %v843_v3, %v842_v61 }
0x130b   :  { %1878 = vmatprep.mubr.msk.bf16.mxu0 %vm196_vm2, %v850_v13 }
0x130c   :  { %v845_v14 = vld [vmem:[#allocation2 + $0x18] sm:$0xff] }
0x130d   :  { %v851_v15 = vpack.c.bf16 %v845_v14, %v844_v51 }
0x130f   :  { %1879 = vmatmul.mubr.msk.bf16.vlgmr.msra.gmra.mxu0 %vm196_vm2, %v851_v15 }
0x1310   :  { %1903 = vmatpush3.bf16.msra.mxu0 %v2400_v16 }
0x1311   :  { %1904 = vmatprep.subr.bf16.mxu0 %v2104_v0 }
0x1314   :  { %1905 = vmatpush3.bf16.msra.mxu0 %v2408_v17 }
0x1315   :  { %1918 = vmatprep.subr.bf16.mxu0 %v2104_v0 }
0x1373   :  { %v766_v20 = vpop.permute.xlu0 %765 }
0x1374   :  { %1871 = vmatmul.mubr.msk.bf16.vlgmr.msra.gmra.mxu1 %vm196_vm2, %v766_v20 }
0x1375   :  { %1887 = vmatpush3.bf16.msra.mxu1 %v2400_v16  ;;  %1890 = vmatprep.mubr.msk.bf16.mxu1 %vm2105_vm0, %v2104_v0 }
0x1376   :  { %1888 = vmatprep.subr.bf16.mxu1 %v2104_v0 }
0x1377   :  { %v1038_v38 = vpop.permute.xlu0 %1037 }
0x1379   :  { %1889 = vmatpush3.bf16.msra.mxu1 %v2408_v17 }
0x137a   :  { %1894 = vmatprep.subr.bf16.mxu1 %v2104_v0 }
0x137c   :  { %1891 = vmatmul.mubr.msk.bf16.vlgmr.msra.gmra.mxu1 %vm196_vm2, %v971_v8 }
0x137d   :  { %1895 = vmatpush3.bf16.msra.mxu1 %v2400_v16  ;;  %1898 = vmatprep.mubr.msk.bf16.mxu1 %vm2105_vm0, %v2104_v0 }
0x137e   :  { %1896 = vmatprep.subr.bf16.mxu1 %v2104_v0 }
0x1381   :  { %1897 = vmatpush3.bf16.msra.mxu1 %v2408_v17 }
0x1382   :  { %1910 = vmatprep.subr.bf16.mxu1 %v2104_v0 }
0x13cf   :  { %v2435_v24 = vpop.f32.mrf.mxu0 }
0x13d1   :  { %v923_v2 = vpop.f32.mrf.mxu0 }
0x13d2   :  { %v924_v5 = vadd.f32 %v2440_v30, %v923_v2 }
0x13d3   :  { %v2471_v61 = vpop.f32.mrf.mxu0 }
0x13d5   :  { %v926_v3 = vpop.f32.mrf.mxu0 }
0x13d6   :  { %v927_v13 = vadd.f32 %v2440_v30, %v926_v3 }
0x1434   :  { %v804_v25 = vpop.f32.mrf.mxu1 }
0x1435   :  { %v810_v26 = vadd.f32 %v804_v25, %v165_v23 }
0x1436   :  { %v1872_v27 = vpop.f32.mrf.mxu1 }
0x1437   :  { %v1704_v45 = vmul.f32 -1.442695, %v810_v26 }
0x1438   :  { %v807_v29 = vpop.f32.mrf.mxu1 }
0x143a   :  { %v1873_v31 = vpop.f32.mrf.mxu1 }
0x143c   :  { %v1021_v32 = vpop.f32.mrf.mxu1 }
0x143d   :  { %v1027_v6 = vadd.f32 %v1021_v32, %v924_v5 }
0x143e   :  { %v1892_v33 = vpop.f32.mrf.mxu1 }
0x143f   :  { %v1717_v34 = vmul.f32 -1.442695, %v1027_v6 }
0x1440   :  { %v1024_v9 = vpop.f32.mrf.mxu1 }
0x1441   :  { %2032 = vpow2.f32 %v1717_v34 }
0x1442   :  { %v1893_v4 = vpop.f32.mrf.mxu1  ;;  %2034 = vtanh.f32 %v1027_v6 }
0x144e   :  { %v2033_v36 = vpop.eup %2032 }
0x144f   :  { %v1031_v37 = vadd.f32 1.0, %v2033_v36  ;;  %v2035_v39 = vpop.eup %2034 }
0x1451   :  { %2036 = vrcp.f32 %v1031_v37 }
0x1452   :  { %2038 = vpow2.f32 %v1704_v45 }
0x145e   :  { %v2037_v41 = vpop.eup %2036 }
0x145f   :  { %v1035_v42 = vsel %vm2230_vm5, %v2035_v39, %v2037_v41  ;;  %v2039_v46 = vpop.eup %2038 }
0x1460   :  { %1042 = vrot.lane.b32.xlu1 %v1035_v42, %s2106_s3  ;;  %v1040_v47 = vmul.f32 %v1038_v38, %v1035_v42  ;;  %v814_v48 = vadd.f32 1.0, %v2039_v46 }
0x14d2   :  { %v1043_v43 = vpop.permute.xlu1 %1042 }
0x14d3   :  { %v1045_v44 = vmul.f32 %v1043_v43, %v1035_v42 }
0x14d5   :  { %1047 = vrot.lane.b32.xlu1 %v1045_v44, %s2107_s22 }
0x1547   :  { %v1048_v49 = vpop.permute.xlu1 %1047 }
0x1548   :  { %v1050_v50 = vadd.f32 %v1048_v49, %v1040_v47  ;;  %v932_v47 = vadd.f32 %v2435_v24, %v2440_v30 }
0x154a   :  { %2040 = vtanh.f32 %v1050_v50 }
0x154b   :  { %2042 = vrcp.f32 %v814_v48 }
0x154c   :  { %2044 = vtanh.f32 %v810_v26 }
0x1557   :  { %v2041_v52 = vpop.eup %2040 }
0x1558   :  { %v2043_v53 = vpop.eup %2042  ;;  %1053 = vrot.lane.b32.xlu0 %v2041_v52, %s2106_s3 }
0x1559   :  { %v2045_v54 = vpop.eup %2044 }
0x155a   :  { %v818_v55 = vsel %vm2230_vm5, %v2045_v54, %v2043_v53 }
0x155b   :  { %v819_v35 = vmul.f32 %v818_v55, %v2372_v58 }
0x155c   :  { %821 = vrot.lane.b32.xlu0 %v818_v55, %s2106_s3 }
0x15ca   :  { %v1054_v1 = vpop.permute.xlu0 %1053 }
0x15cb   :  { %v1056_v56 = vmul.f32 %v1054_v1, %v1035_v42 }
0x15cd   :  { %v1058_v57 = vpack.c.bf16 %v1056_v56, %v1056_v56 }
0x15ce   :  { %v822_v59 = vpop.permute.xlu0 %821 }
0x15cf   :  { %v824_v60 = vmul.f32 %v822_v59, %v818_v55  ;;  %1060 = vrot.lane.b32.xlu1 %v1058_v57, %s2107_s22 }
0x15d1   :  { %826 = vrot.lane.b32.xlu0 %v824_v60, %s2107_s22 }
0x1641   :  { %v1061_v62 = vpop.permute.xlu1 %1060 }
0x1642   :  { %1899 = vmatmul.mubr.msk.bf16.vlgmr.msra.gmra.mxu1 %vm196_vm2, %v1061_v62 }
0x1643   :  { %v827_v28 = vpop.permute.xlu0 %826  ;;  %1911 = vmatpush3.bf16.msra.mxu1 %v2400_v16  ;;  %1914 = vmatprep.mubr.msk.bf16.mxu1 %vm2105_vm0, %v2104_v0 }
0x1644   :  { %v2458_v63 = vadd.f32 %v827_v28, %v819_v35  ;;  %1912 = vmatprep.subr.bf16.mxu1 %v2104_v0 }
0x1646   :  { %2046 = vtanh.f32 %v2458_v63 }
0x1647   :  { %1913 = vmatpush3.bf16.msra.mxu1 %v2408_v17 }
0x1648   :  { %1926 = vmatprep.subr.bf16.mxu1 %v2104_v0 }
0x1653   :  { %v2047_v10 = vpop.eup %2046 }
0x1654   :  { %832 = vrot.lane.b32.xlu0 %v2047_v10, %s2106_s3 }
0x1658   :  { %594 = vrot.lane.b32.xlu0 %v2337_v18, %s2107_s22 }
0x165c   :  { %756 = vrot.lane.b32.xlu0 %v2389_v7, %s2107_s22 }
0x16c6   :  { %v833_v58 = vpop.permute.xlu0 %832 }
0x16c7   :  { %v835_v32 = vmul.f32 %v833_v58, %v818_v55 }
0x16ca   :  { %v595_v11 = vpop.permute.xlu0 %594 }
0x16cb   :  { %598 = vst.msk [vmem:[#allocation2 + $0x20] sm:$0xff] %vm196_vm2, %v595_v11 }
0x16ce   :  { %v757_v12 = vpop.permute.xlu0 %756 }
0x16cf   :  { %760 = vst.msk [vmem:[#allocation2 + $0x30] sm:$0xff] %vm196_vm2, %v757_v12 }
0x16d6   :  { %v848_v39 = vld [vmem:[#allocation2 + $0x30] sm:$0xff] }
0x1702   :  { %v1099_v51 = vpop.f32.mrf.mxu1 }
0x1703   :  { %v1105_v14 = vadd.f32 %v1099_v51, %v927_v13  ;;  %v935_v13 = vadd.f32 %v2471_v61, %v2440_v30 }
0x1704   :  { %v1900_v15 = vpop.f32.mrf.mxu1 }
0x1705   :  { %v1719_v19 = vmul.f32 -1.442695, %v1105_v14 }
0x1706   :  { %v1102_v18 = vpop.f32.mrf.mxu1 }
0x1707   :  { %2048 = vpow2.f32 %v1719_v19 }
0x1708   :  { %v1901_v20 = vpop.f32.mrf.mxu1  ;;  %2050 = vtanh.f32 %v1105_v14 }
0x1714   :  { %v2049_v7 = vpop.eup %2048 }
0x1715   :  { %v1109_v21 = vadd.f32 1.0, %v2049_v7  ;;  %v2051_v8 = vpop.eup %2050 }
0x1717   :  { %2052 = vrcp.f32 %v1109_v21 }
0x1724   :  { %v2053_v23 = vpop.eup %2052 }
0x1725   :  { %v1113_v25 = vsel %vm2230_vm5, %v2051_v8, %v2053_v23 }
0x1726   :  { %1116 = vrot.lane.b32.xlu1 %v1113_v25, %s2106_s3  ;;  %v1114_v2 = vmul.f32 %v1113_v25, %v1050_v50 }
0x1798   :  { %v1117_v26 = vpop.permute.xlu1 %1116 }
0x1799   :  { %v1119_v27 = vmul.f32 %v1117_v26, %v1113_v25 }
0x179b   :  { %1121 = vrot.lane.b32.xlu1 %v1119_v27, %s2107_s22 }
0x180d   :  { %v1122_v29 = vpop.permute.xlu1 %1121 }
0x180e   :  { %v1124_v31 = vadd.f32 %v1122_v29, %v1114_v2 }
0x1810   :  { %2054 = vtanh.f32 %v1124_v31 }
0x181d   :  { %v2055_v5 = vpop.eup %2054 }
0x181e   :  { %1127 = vrot.lane.b32.xlu1 %v2055_v5, %s2106_s3 }
0x1822   :  { %675 = vrot.lane.b32.xlu1 %v2356_v40, %s2107_s22  ;;  %v846_v40 = vld [vmem:[#allocation2 + $0x20] sm:$0xff] }
0x1826   :  { %837 = vrot.lane.b32.xlu1 %v835_v32, %s2107_s22 }
0x1890   :  { %v1128_v6 = vpop.permute.xlu1 %1127 }
0x1891   :  { %v1130_v33 = vmul.f32 %v1128_v6, %v1113_v25 }
0x1893   :  { %v1132_v34 = vpack.c.bf16 %v1130_v33, %v1130_v33 }
0x1894   :  { %v676_v9 = vpop.permute.xlu1 %675 }
0x1895   :  { %679 = vst.msk [vmem:[#allocation2 + $0x28] sm:$0xff] %vm196_vm2, %v676_v9  ;;  %1134 = vrot.lane.b32.xlu0 %v1132_v34, %s2107_s22 }
0x1898   :  { %v838_v4 = vpop.permute.xlu1 %837 }
0x1899   :  { %841 = vst.msk [vmem:[#allocation2 + $0x38] sm:$0xff] %vm196_vm2, %v838_v4  ;;  %1647 = vst.msk [vmem:[%s2617_s12] sm:$0xff] %vm196_vm2, %v838_v4 }
0x189c   :  { %v847_v36 = vld [vmem:[#allocation2 + $0x28] sm:$0xff] }
0x189d   :  { %v852_v37 = vpack.c.bf16 %v847_v36, %v846_v40 }
0x189f   :  { %1882 = vmatprep.mubr.msk.bf16.mxu0 %vm196_vm2, %v852_v37 }
0x18a0   :  { %v849_v41 = vld [vmem:[#allocation2 + $0x38] sm:$0xff] }
0x18a1   :  { %v853_v42 = vpack.c.bf16 %v849_v41, %v848_v39 }
0x18a3   :  { %1883 = vmatmul.mubr.msk.bf16.gmra.mxu0 %vm196_vm2, %v853_v42 }
0x18a4   :  { %1906 = vmatprep.mubr.msk.bf16.mxu0 %vm2105_vm0, %v2104_v0 }
0x1907   :  { %v1135_v43 = vpop.permute.xlu0 %1134 }
0x1908   :  { %1907 = vmatmul.mubr.msk.bf16.vlgmr.msra.gmra.mxu0 %vm196_vm2, %v1135_v43 }
0x1909   :  { %1919 = vmatpush3.bf16.msra.mxu0 %v2400_v16  ;;  %1922 = vmatprep.mubr.msk.bf16.mxu0 %vm2105_vm0, %v2104_v0 }
0x190a   :  { %1920 = vmatprep.subr.bf16.mxu0 %v2104_v0 }
0x190d   :  { %1921 = vmatpush3.bf16.msra.mxu0 %v2408_v17 }
0x190e   :  { %1934 = vmatprep.subr.bf16.mxu0 %v2104_v0 }
0x1963   :  { %v2500_v44 = vpop.f32.mrf.mxu0 }
0x1965   :  { %v2502_v45 = vpop.f32.mrf.mxu0 }
0x1966   :  { %v940_v34 = vadd.f32 %v2440_v30, %v2502_v45 }
0x1967   :  { %v2504_v38 = vpop.f32.mrf.mxu0 }
0x1969   :  { %v2506_v46 = vpop.f32.mrf.mxu0 }
0x19c8   :  { %v1173_v48 = vpop.f32.mrf.mxu0 }
0x19c9   :  { %v1179_v49 = vadd.f32 %v1173_v48, %v932_v47 }
0x19ca   :  { %v1908_v50 = vpop.f32.mrf.mxu0 }
0x19cb   :  { %v1721_v52 = vmul.f32 -1.442695, %v1179_v49 }
0x19cc   :  { %v1176_v53 = vpop.f32.mrf.mxu0 }
0x19cd   :  { %2056 = vpow2.f32 %v1721_v52 }
0x19ce   :  { %v1909_v54 = vpop.f32.mrf.mxu0  ;;  %2058 = vtanh.f32 %v1179_v49 }
0x19da   :  { %v2057_v55 = vpop.eup %2056 }
0x19db   :  { %v1183_v1 = vadd.f32 1.0, %v2057_v55  ;;  %v2059_v56 = vpop.eup %2058 }
0x19dd   :  { %2060 = vrcp.f32 %v1183_v1 }
0x19ea   :  { %v2061_v57 = vpop.eup %2060 }
0x19eb   :  { %v1187_v59 = vsel %vm2230_vm5, %v2059_v56, %v2061_v57 }
0x19ec   :  { %1190 = vrot.lane.b32.xlu1 %v1187_v59, %s2106_s3  ;;  %v1188_v62 = vmul.f32 %v1187_v59, %v1124_v31 }
0x1a5e   :  { %v1191_v60 = vpop.permute.xlu1 %1190 }
0x1a5f   :  { %v1193_v24 = vmul.f32 %v1191_v60, %v1187_v59 }
0x1a61   :  { %1195 = vrot.lane.b32.xlu0 %v1193_v24, %s2107_s22 }
0x1ad3   :  { %v1196_v35 = vpop.permute.xlu0 %1195 }
0x1ad4   :  { %v1198_v28 = vadd.f32 %v1196_v35, %v1188_v62 }
0x1ad6   :  { %2062 = vtanh.f32 %v1198_v28 }
0x1ae3   :  { %v2063_v10 = vpop.eup %2062 }
0x1ae4   :  { %1201 = vrot.lane.b32.xlu1 %v2063_v10, %s2106_s3 }
0x1b56   :  { %v1202_v58 = vpop.permute.xlu1 %1201 }
0x1b57   :  { %v1204_v11 = vmul.f32 %v1202_v58, %v1187_v59  ;;  %v943_v59 = vadd.f32 %v2440_v30, %v2506_v46 }
0x1b59   :  { %v1206_v12 = vpack.c.bf16 %v1204_v11, %v1204_v11 }
0x1b5b   :  { %1208 = vrot.lane.b32.xlu0 %v1206_v12, %s2107_s22 }
0x1bcd   :  { %v1209_v3 = vpop.permute.xlu0 %1208 }
0x1bce   :  { %1915 = vmatmul.mubr.msk.bf16.vlgmr.msra.gmra.mxu1 %vm196_vm2, %v1209_v3 }
0x1bcf   :  { %1927 = vmatpush3.bf16.msra.mxu1 %v2400_v16  ;;  %1930 = vmatprep.mubr.msk.bf16.mxu1 %vm2105_vm0, %v2104_v0 }
0x1bd0   :  { %1928 = vmatprep.subr.bf16.mxu1 %v2104_v0 }
0x1bd3   :  { %1929 = vmatpush3.bf16.msra.mxu1 %v2408_v17 }
0x1bd4   :  { %1942 = vmatprep.subr.bf16.mxu1 %v2104_v0 }
0x1c8e   :  { %v1247_v51 = vpop.f32.mrf.mxu1 }
0x1c8f   :  { %v1253_v14 = vadd.f32 %v1247_v51, %v935_v13 }
0x1c90   :  { %v1916_v15 = vpop.f32.mrf.mxu1 }
0x1c91   :  { %v1723_v19 = vmul.f32 -1.442695, %v1253_v14 }
0x1c92   :  { %v1250_v18 = vpop.f32.mrf.mxu1 }
0x1c93   :  { %2064 = vpow2.f32 %v1723_v19 }
0x1c94   :  { %v1917_v20 = vpop.f32.mrf.mxu1  ;;  %2066 = vtanh.f32 %v1253_v14 }
0x1ca0   :  { %v2065_v7 = vpop.eup %2064 }
0x1ca1   :  { %v1257_v21 = vadd.f32 1.0, %v2065_v7  ;;  %v2067_v8 = vpop.eup %2066 }
0x1ca3   :  { %2068 = vrcp.f32 %v1257_v21  ;;  %v948_v21 = vadd.f32 %v2500_v44, %v2440_v30 }
0x1cb0   :  { %v2069_v23 = vpop.eup %2068 }
0x1cb1   :  { %v1261_v25 = vsel %vm2230_vm5, %v2067_v8, %v2069_v23 }
0x1cb2   :  { %1264 = vrot.lane.b32.xlu1 %v1261_v25, %s2106_s3  ;;  %v1262_v27 = vmul.f32 %v1261_v25, %v1198_v28 }
0x1d24   :  { %v1265_v26 = vpop.permute.xlu1 %1264 }
0x1d25   :  { %v1267_v61 = vmul.f32 %v1265_v26, %v1261_v25 }
0x1d27   :  { %1269 = vrot.lane.b32.xlu0 %v1267_v61, %s2107_s22 }
0x1d99   :  { %v1270_v2 = vpop.permute.xlu0 %1269 }
0x1d9a   :  { %v1272_v29 = vadd.f32 %v1270_v2, %v1262_v27 }
0x1d9c   :  { %2070 = vtanh.f32 %v1272_v29 }
0x1da9   :  { %v2071_v31 = vpop.eup %2070 }
0x1daa   :  { %1275 = vrot.lane.b32.xlu1 %v2071_v31, %s2106_s3 }
0x1e1c   :  { %v1276_v5 = vpop.permute.xlu1 %1275 }
0x1e1d   :  { %v1278_v32 = vmul.f32 %v1276_v5, %v1261_v25 }
0x1e1f   :  { %v1280_v6 = vpack.c.bf16 %v1278_v32, %v1278_v32 }
0x1e21   :  { %1282 = vrot.lane.b32.xlu0 %v1280_v6, %s2107_s22 }
0x1e93   :  { %v1283_v33 = vpop.permute.xlu0 %1282 }
0x1e94   :  { %1923 = vmatmul.mubr.msk.bf16.vlgmr.msra.gmra.mxu0 %vm196_vm2, %v1283_v33 }
0x1e95   :  { %1935 = vmatpush3.bf16.msra.mxu0 %v2400_v16  ;;  %1938 = vmatprep.mubr.msk.bf16.mxu0 %vm2105_vm0, %v2104_v0 }
0x1e96   :  { %1936 = vmatprep.subr.bf16.mxu0 %v2104_v0 }
0x1e99   :  { %1937 = vmatpush3.bf16.msra.mxu0 %v2408_v17 }
0x1e9a   :  { %1950 = vmatprep.subr.bf16.mxu0 %v2104_v0 }
0x1f54   :  { %v1321_v9 = vpop.f32.mrf.mxu0 }
0x1f55   :  { %v1327_v4 = vadd.f32 %v1321_v9, %v940_v34 }
0x1f56   :  { %v1924_v40 = vpop.f32.mrf.mxu0 }
0x1f57   :  { %v1725_v36 = vmul.f32 -1.442695, %v1327_v4 }
0x1f58   :  { %v1324_v37 = vpop.f32.mrf.mxu0 }
0x1f59   :  { %2072 = vpow2.f32 %v1725_v36 }
0x1f5a   :  { %v1925_v39 = vpop.f32.mrf.mxu0  ;;  %2074 = vtanh.f32 %v1327_v4 }
0x1f66   :  { %v2073_v41 = vpop.eup %2072 }
0x1f67   :  { %v1331_v42 = vadd.f32 1.0, %v2073_v41  ;;  %v2075_v43 = vpop.eup %2074  ;;  %v951_v41 = vadd.f32 %v2504_v38, %v2440_v30 }
0x1f69   :  { %2076 = vrcp.f32 %v1331_v42 }
0x1f76   :  { %v2077_v47 = vpop.eup %2076 }
0x1f77   :  { %v1335_v48 = vsel %vm2230_vm5, %v2075_v43, %v2077_v47 }
0x1f78   :  { %1338 = vrot.lane.b32.xlu1 %v1335_v48, %s2106_s3  ;;  %v1336_v50 = vmul.f32 %v1335_v48, %v1272_v29 }
0x1fea   :  { %v1339_v49 = vpop.permute.xlu1 %1338 }
0x1feb   :  { %v1341_v45 = vmul.f32 %v1339_v49, %v1335_v48 }
0x1fed   :  { %1343 = vrot.lane.b32.xlu0 %v1341_v45, %s2107_s22 }
0x205f   :  { %v1344_v52 = vpop.permute.xlu0 %1343 }
0x2060   :  { %v1346_v53 = vadd.f32 %v1344_v52, %v1336_v50 }
0x2062   :  { %2078 = vtanh.f32 %v1346_v53 }
0x206f   :  { %v2079_v54 = vpop.eup %2078 }
0x2070   :  { %1349 = vrot.lane.b32.xlu1 %v2079_v54, %s2106_s3 }
0x20e2   :  { %v1350_v55 = vpop.permute.xlu1 %1349 }
0x20e3   :  { %v1352_v1 = vmul.f32 %v1350_v55, %v1335_v48 }
0x20e5   :  { %v1354_v56 = vpack.c.bf16 %v1352_v1, %v1352_v1 }
0x20e7   :  { %1356 = vrot.lane.b32.xlu0 %v1354_v56, %s2107_s22 }
0x2159   :  { %v1357_v57 = vpop.permute.xlu0 %1356 }
0x215a   :  { %1931 = vmatmul.mubr.msk.bf16.vlgmr.msra.gmra.mxu1 %vm196_vm2, %v1357_v57 }
0x215b   :  { %1943 = vmatpush3.bf16.msra.mxu1 %v2400_v16  ;;  %1946 = vmatprep.mubr.msk.bf16.mxu1 %vm2105_vm0, %v2104_v0 }
0x215c   :  { %1944 = vmatprep.subr.bf16.mxu1 %v2104_v0 }
0x215f   :  { %1945 = vmatpush3.bf16.msra.mxu1 %v2408_v17 }
0x221a   :  { %v1395_v60 = vpop.f32.mrf.mxu1 }
0x221b   :  { %v1401_v24 = vadd.f32 %v1395_v60, %v943_v59  ;;  %v1974_v59 = vld [vmem:[%s2618_s7 + $0x8] sm:$0xff]  }
0x221c   :  { %v1932_v62 = vpop.f32.mrf.mxu1 }
0x221d   :  { %v1727_v35 = vmul.f32 -1.442695, %v1401_v24 }
0x221e   :  { %v1398_v28 = vpop.f32.mrf.mxu1 }
0x221f   :  { %2080 = vpow2.f32 %v1727_v35 }
0x2220   :  { %v1933_v10 = vpop.f32.mrf.mxu1  ;;  %2082 = vtanh.f32 %v1401_v24 }
0x222c   :  { %v2081_v58 = vpop.eup %2080 }
0x222d   :  { %v1405_v11 = vadd.f32 1.0, %v2081_v58  ;;  %v2083_v16 = vpop.eup %2082 }
0x222f   :  { %2084 = vrcp.f32 %v1405_v11 }
0x223c   :  { %v2085_v12 = vpop.eup %2084 }
0x223d   :  { %v1409_v3 = vsel %vm2230_vm5, %v2083_v16, %v2085_v12 }
0x223e   :  { %1412 = vrot.lane.b32.xlu1 %v1409_v3, %s2106_s3  ;;  %v1410_v13 = vmul.f32 %v1409_v3, %v1346_v53 }
0x22b0   :  { %v1413_v17 = vpop.permute.xlu1 %1412 }
0x22b1   :  { %v1415_v46 = vmul.f32 %v1413_v17, %v1409_v3 }
0x22b3   :  { %1417 = vrot.lane.b32.xlu0 %v1415_v46, %s2107_s22 }
0x2325   :  { %v1418_v51 = vpop.permute.xlu0 %1417 }
0x2326   :  { %v1420_v14 = vadd.f32 %v1418_v51, %v1410_v13 }
0x2328   :  { %2086 = vtanh.f32 %v1420_v14 }
0x2335   :  { %v2087_v15 = vpop.eup %2086 }
0x2336   :  { %1423 = vrot.lane.b32.xlu1 %v2087_v15, %s2106_s3 }
0x23a8   :  { %v1424_v19 = vpop.permute.xlu1 %1423 }
0x23a9   :  { %v1426_v18 = vmul.f32 %v1424_v19, %v1409_v3 }
0x23ab   :  { %v1428_v20 = vpack.c.bf16 %v1426_v18, %v1426_v18 }
0x23ad   :  { %1430 = vrot.lane.b32.xlu0 %v1428_v20, %s2107_s22 }
0x241f   :  { %v1431_v7 = vpop.permute.xlu0 %1430 }
0x2420   :  { %1939 = vmatmul.mubr.msk.bf16.vlgmr.msra.gmra.mxu0 %vm196_vm2, %v1431_v7 }
0x2421   :  { %1954 = vmatprep.mubr.msk.bf16.mxu0 %vm2105_vm0, %v2104_v0  ;;  %1951 = vmatpush3.bf16.msra.mxu0 %v1974_v59 }
0x2422   :  { %1952 = vmatprep.subr.bf16.mxu0 %v2104_v0 }
0x2425   :  { %1953 = vmatpush3.bf16.msra.mxu0 %v1975_v22 }
0x24e0   :  { %v1469_v8 = vpop.f32.mrf.mxu0 }
0x24e1   :  { %v1475_v23 = vadd.f32 %v1469_v8, %v948_v21 }
0x24e2   :  { %v1940_v25 = vpop.f32.mrf.mxu0 }
0x24e3   :  { %v1729_v26 = vmul.f32 -1.442695, %v1475_v23 }
0x24e4   :  { %v1472_v61 = vpop.f32.mrf.mxu0 }
0x24e5   :  { %2088 = vpow2.f32 %v1729_v26 }
0x24e6   :  { %v1941_v27 = vpop.f32.mrf.mxu0  ;;  %2090 = vtanh.f32 %v1475_v23 }
0x24f2   :  { %v2089_v2 = vpop.eup %2088 }
0x24f3   :  { %v1479_v29 = vadd.f32 1.0, %v2089_v2  ;;  %v2091_v31 = vpop.eup %2090 }
0x24f5   :  { %2092 = vrcp.f32 %v1479_v29 }
0x2502   :  { %v2093_v5 = vpop.eup %2092 }
0x2503   :  { %v1483_v32 = vsel %vm2230_vm5, %v2091_v31, %v2093_v5 }
0x2504   :  { %1486 = vrot.lane.b32.xlu1 %v1483_v32, %s2106_s3  ;;  %v1484_v33 = vmul.f32 %v1483_v32, %v1420_v14 }
0x2576   :  { %v1487_v6 = vpop.permute.xlu1 %1486 }
0x2577   :  { %v1489_v44 = vmul.f32 %v1487_v6, %v1483_v32 }
0x2579   :  { %1491 = vrot.lane.b32.xlu0 %v1489_v44, %s2107_s22 }
0x25eb   :  { %v1492_v34 = vpop.permute.xlu0 %1491 }
0x25ec   :  { %v1494_v9 = vadd.f32 %v1492_v34, %v1484_v33 }
0x25ee   :  { %2094 = vtanh.f32 %v1494_v9 }
0x25fb   :  { %v2095_v4 = vpop.eup %2094 }
0x25fc   :  { %1497 = vrot.lane.b32.xlu1 %v2095_v4, %s2106_s3 }
0x266e   :  { %v1498_v40 = vpop.permute.xlu1 %1497 }
0x266f   :  { %v1500_v36 = vmul.f32 %v1498_v40, %v1483_v32 }
0x2671   :  { %v1502_v37 = vpack.c.bf16 %v1500_v36, %v1500_v36 }
0x2673   :  { %1504 = vrot.lane.b32.xlu0 %v1502_v37, %s2107_s22 }
0x26e5   :  { %v1505_v39 = vpop.permute.xlu0 %1504 }
0x26e6   :  { %1947 = vmatmul.mubr.msk.bf16.vlgmr.msra.gmra.mxu1 %vm196_vm2, %v1505_v39 }
0x27a6   :  { %v1543_v42 = vpop.f32.mrf.mxu1 }
0x27a7   :  { %v1549_v43 = vadd.f32 %v1543_v42, %v951_v41 }
0x27a8   :  { %v1948_v47 = vpop.f32.mrf.mxu1 }
0x27a9   :  { %v1731_v48 = vmul.f32 -1.442695, %v1549_v43 }
0x27aa   :  { %v1546_v49 = vpop.f32.mrf.mxu1 }
0x27ab   :  { %2096 = vpow2.f32 %v1731_v48 }
0x27ac   :  { %v1949_v45 = vpop.f32.mrf.mxu1  ;;  %2098 = vtanh.f32 %v1549_v43 }
0x27b8   :  { %v2097_v50 = vpop.eup %2096 }
0x27b9   :  { %v1553_v52 = vadd.f32 1.0, %v2097_v50  ;;  %v2099_v53 = vpop.eup %2098 }
0x27bb   :  { %2100 = vrcp.f32 %v1553_v52 }
0x27c8   :  { %v2101_v54 = vpop.eup %2100 }
0x27c9   :  { %v1557_v55 = vsel %vm2230_vm5, %v2099_v53, %v2101_v54 }
0x27ca   :  { %1560 = vrot.lane.b32.xlu1 %v1557_v55, %s2106_s3  ;;  %v1558_v38 = vmul.f32 %v1557_v55, %v1494_v9 }
0x283c   :  { %v1561_v1 = vpop.permute.xlu1 %1560 }
0x283d   :  { %v1563_v30 = vmul.f32 %v1561_v1, %v1557_v55 }
0x283f   :  { %1565 = vrot.lane.b32.xlu0 %v1563_v30, %s2107_s22 }
0x28b1   :  { %v1566_v56 = vpop.permute.xlu0 %1565 }
0x28b2   :  { %v1568_v57 = vadd.f32 %v1566_v56, %v1558_v38 }
0x28b4   :  { %2102 = vtanh.f32 %v1568_v57 }
0x28c1   :  { %v2103_v60 = vpop.eup %2102 }
0x28c2   :  { %1571 = vrot.lane.b32.xlu1 %v2103_v60, %s2106_s3 }
0x2934   :  { %v1572_v24 = vpop.permute.xlu1 %1571 }
0x2935   :  { %v1574_v62 = vmul.f32 %v1572_v24, %v1557_v55 }
0x2937   :  { %v1575_v35 = vpack.c.bf16 %v1574_v62, %v1574_v62  ;;  %1649 = vrot.lane.b32.xlu1 %v1574_v62, %s2107_s22 }
0x2939   :  { %1588 = vrot.lane.b32.xlu0 %v1575_v35, %s2107_s22 }
0x293b   :  { %1660 = vrot.lane.b32.xlu1 %v1568_v57, %s2108_s23 }
0x293d   :  { %1655 = vrot.lane.b32.xlu0 %v2458_v63, %s2108_s23  ;;  %v1732_v63 = vld [vmem:[%s2620_s8] ss:$0 sm:$0xff] }
0x29a9   :  { %v1650_v28 = vpop.permute.xlu1 %1649 }
0x29aa   :  { %1736 = vst.msk [vmem:[%s2617_s12 + $0x8] sm:$0xff] %vm196_vm2, %v1650_v28 }
0x29ab   :  { %v1589_v0 = vpop.permute.xlu0 %1588 }
0x29ac   :  { %1955 = vmatmul.mubr.msk.bf16.vlgmr.msra.gmra.mxu0 %vm196_vm2, %v1589_v0 }
0x29ad   :  { %v1661_v10 = vpop.permute.xlu1 %1660 }
0x29ae   :  { %1737 = vst.msk [vmem:[%s2619_s13 + $0x8] sm:$0xff] %vm196_vm2, %v1661_v10 }
0x29af   :  { %v1656_v58 = vpop.permute.xlu0 %1655 }
0x29b0   :  { %1658 = vst.msk [vmem:[%s2619_s13] sm:$0xff] %vm196_vm2, %v1656_v58 }
0x2a6c   :  { %v1639_v11 = vpop.f32.mrf.mxu0 }
0x2a6d   :  { %v1640_v16 = vadd.f32 %v1732_v63, %v1639_v11 }
0x2a6e   :  { %v1956_v12 = vpop.f32.mrf.mxu0 }
0x2a6f   :  { %1646 = vst.msk [vmem:[%s2621_s11] sm:$0xff] %vm1645_vm6, %v1640_v16 }
0x2a70   :  { %v1642_v3 = vpop.f32.mrf.mxu0 }
0x2a72   :  { %v1957_v17 = vpop.f32.mrf.mxu0 }

</bundles_post_ra>
